<compile_context>
chip_gen: v7x
topology: tpu7x:2x2x1
jax: 0.10.0
libtpu: 0.0.40
codegen_flags: <defaults>
</compile_context>

<pallas_src>
import functools

import jax
import jax.numpy as jnp
from jax.experimental import pallas as pl
from jax.experimental.pallas import tpu as pltpu

EPS = 1e-5
LANE = 128


def _round_up(x, m):
    return (x + m - 1) // m * m


def _compiler_params():
    return pltpu.CompilerParams(
        dimension_semantics=("parallel",),      # grid steps (images) independent
        vmem_limit_bytes=32 * 1024 * 1024,
    )


# ------------------------------ Pallas kernels ------------------------------

def _conv1_kernel(*refs, stride, Ho, Wo, has_sc):
    """conv1 (3x3, stride s, pad 1) via 9-tap MXU accumulation, plus optional
    fused 1x1 shortcut conv (centre tap).  Emits raw conv outputs and
    per-image BN partial sums (sum, sum of squares)."""
    if has_sc:
        ph_ref, w1_ref, ws_ref, y1_ref, st1_ref, ysc_ref, stsc_ref = refs
    else:
        ph_ref, w1_ref, y1_ref, st1_ref = refs
        ws_ref = ysc_ref = stsc_ref = None

    s = stride
    Cin = w1_ref.shape[1]
    Cp = w1_ref.shape[2]
    M = Ho * Wo

    # Preload the s*s polyphase components of the padded input once (bf16).
    phases = [ph_ref[0, i] for i in range(s * s)]          # each (R, Rw, Cin)

    acc = jnp.zeros((M, Cp), jnp.float32)
    for t in range(9):                                      # static unroll
        dh, dw = divmod(t, 3)
        p = (dh % s) * s + (dw % s)
        qh, qw = dh // s, dw // s
        tap = phases[p][qh:qh + Ho, qw:qw + Wo, :].reshape(M, Cin)
        acc = acc + jnp.dot(tap, w1_ref[t], preferred_element_type=jnp.float32)

    y1_ref[...] = acc.reshape(1, Ho, Wo, Cp)
    st = jnp.concatenate(
        [jnp.sum(acc, axis=0, keepdims=True),
         jnp.sum(acc * acc, axis=0, keepdims=True)], axis=0)
    st1_ref[...] = st.reshape(1, 2, Cp)

    if has_sc:
        # 1x1 stride-s conv == centre tap (dh=dw=1) of the same padded input.
        p = (1 % s) * s + (1 % s)
        q = 1 // s
        ctr = phases[p][q:q + Ho, q:q + Wo, :].reshape(M, Cin)
        ysc = jnp.dot(ctr, ws_ref[...], preferred_element_type=jnp.float32)
        ysc_ref[...] = ysc.reshape(1, Ho, Wo, Cp)
        sts = jnp.concatenate(
            [jnp.sum(ysc, axis=0, keepdims=True),
             jnp.sum(ysc * ysc, axis=0, keepdims=True)], axis=0)
        stsc_ref[...] = sts.reshape(1, 2, Cp)


def _conv2_kernel(y1_ref, s1_ref, h1_ref, w2_ref, y2_ref, st2_ref, pad_ref,
                  *, Ho, Wo):
    """Apply folded bn1 (scale/shift) + ReLU to the conv1 output, zero-pad it
    in a VMEM scratch, then conv2 (3x3, stride 1) via 9-tap MXU accumulation.
    Emits raw conv2 output and per-image BN partial sums."""
    Cp = w2_ref.shape[2]
    M = Ho * Wo

    scale = s1_ref[...].reshape(1, 1, Cp)
    shift = h1_ref[...].reshape(1, 1, Cp)
    o1 = jnp.maximum(y1_ref[0] * scale + shift, 0.0)        # (Ho, Wo, Cp) f32

    # Build the spatially padded activation in a VMEM scratch (border = 0).
    pad_ref[...] = jnp.zeros_like(pad_ref)
    pad_ref[1:Ho + 1, 1:Wo + 1, :] = o1

    acc = jnp.zeros((M, Cp), jnp.float32)
    for t in range(9):                                      # static unroll
        dh, dw = divmod(t, 3)
        tap = pad_ref[dh:dh + Ho, dw:dw + Wo, :].reshape(M, Cp)
        acc = acc + jnp.dot(tap.astype(jnp.bfloat16), w2_ref[t],
                            preferred_element_type=jnp.float32)

    y2_ref[...] = acc.reshape(1, Ho, Wo, Cp)
    st = jnp.concatenate(
        [jnp.sum(acc, axis=0, keepdims=True),
         jnp.sum(acc * acc, axis=0, keepdims=True)], axis=0)
    st2_ref[...] = st.reshape(1, 2, Cp)


def _bn_add_relu_kernel(y2_ref, sc_ref, s2_ref, h2_ref, ss_ref, hs_ref, o_ref):
    """out = relu(bn2(y2) + bn_sc(shortcut)) with BN folded into scale/shift."""
    Cp = y2_ref.shape[-1]
    s2 = s2_ref[...].reshape(1, 1, 1, Cp)
    h2 = h2_ref[...].reshape(1, 1, 1, Cp)
    ss = ss_ref[...].reshape(1, 1, 1, Cp)
    hs = hs_ref[...].reshape(1, 1, 1, Cp)
    out = y2_ref[...] * s2 + h2 + sc_ref[...] * ss + hs
    o_ref[...] = jnp.maximum(out, 0.0)


# -------------------------------- JAX glue ----------------------------------

def _polyphase(x_bf16, stride, Ho, Wo):
    """Decompose the spatially padded input into its stride-phase components.

    Returns (N, s*s, R, Rw, C) with R = Ho + 2//s, Rw = Wo + 2//s.  This is a
    1x-sized permutation of the padded input (no 9x im2col inflation); the
    kernel rebuilds all 9 taps from it with static slices."""
    s = stride
    N, H, W, C = x_bf16.shape
    q = 2 // s
    R, Rw = Ho + q, Wo + q
    Hp = max(s * R, H + 2)
    Wp = max(s * Rw, W + 2)
    xp = jnp.pad(x_bf16, ((0, 0), (1, Hp - H - 1), (1, Wp - W - 1), (0, 0)))
    phases = [xp[:, ph::s, pw::s, :][:, :R, :Rw, :]
              for ph in range(s) for pw in range(s)]
    return jnp.stack(phases, axis=1)                        # (N, s*s, R, Rw, C)


def _finalize_bn(stats, gamma, beta, count):
    """Fold per-image (sum, sum_sq) partials into per-channel scale/shift."""
    tot = jnp.sum(stats, axis=0)                            # (2, Cp)
    mean = tot[0] / count
    var = jnp.maximum(tot[1] / count - mean * mean, 0.0)    # biased, as PyTorch
    scale = gamma * jax.lax.rsqrt(var + EPS)
    shift = beta - mean * scale
    return scale.reshape(1, -1), shift.reshape(1, -1)


def init_basic_block_params(key, in_planes, planes, stride=1, wide=1):
    planes = planes * wide
    ks = jax.random.split(key, 8)
    p = {
        "stride": stride,
        "w1": 0.1 * jax.random.normal(ks[0], (planes, in_planes, 3, 3), jnp.float32),
        "g1": 1.0 + 0.1 * jax.random.normal(ks[1], (planes,), jnp.float32),
        "b1": 0.1 * jax.random.normal(ks[2], (planes,), jnp.float32),
        "w2": 0.1 * jax.random.normal(ks[3], (planes, planes, 3, 3), jnp.float32),
        "g2": 1.0 + 0.1 * jax.random.normal(ks[4], (planes,), jnp.float32),
        "b2": 0.1 * jax.random.normal(ks[5], (planes,), jnp.float32),
        "has_shortcut": (stride != 1 or in_planes != planes),   # expansion == 1
    }
    if p["has_shortcut"]:
        p["ws"] = 0.1 * jax.random.normal(ks[6], (planes, in_planes, 1, 1), jnp.float32)
        p["gs"] = 1.0 + 0.1 * jax.random.normal(ks[7], (planes,), jnp.float32)
        p["bs"] = jnp.zeros((planes,), jnp.float32)
    return p


def prepare_basic_block_params(p):
    """One-time conversion of PyTorch-layout weights into MXU-ready operands:
    per-tap (9, Cin, Cp) bf16 matrices with Cout zero-padded to 128 lanes and
    lane-padded f32 gamma/beta vectors."""
    cout, cin = p["w1"].shape[0], p["w1"].shape[1]
    cp = _round_up(cout, LANE)

    def conv3x3_to_taps(w, pad_cin_to=None):
        ci = w.shape[1]
        m = jnp.transpose(w, (2, 3, 1, 0)).reshape(9, ci, cout)   # (9, Cin, Cout)
        ci_t = ci if pad_cin_to is None else pad_cin_to
        return jnp.pad(m, ((0, 0), (0, ci_t - ci), (0, cp - cout))
                       ).astype(jnp.bfloat16)

    def pad_vec(v, fill):
        return jnp.pad(v, (0, cp - cout), constant_values=fill).astype(jnp.float32)

    pp = {
        "stride": p["stride"],
        "has_shortcut": p["has_shortcut"],
        "cout": cout, "cin": cin, "cp": cp,
        "w1m": conv3x3_to_taps(p["w1"]),
        "w2m": conv3x3_to_taps(p["w2"], pad_cin_to=cp),    # conv2 input is lane-padded
        "g1": pad_vec(p["g1"], 1.0), "b1": pad_vec(p["b1"], 0.0),
        "g2": pad_vec(p["g2"], 1.0), "b2": pad_vec(p["b2"], 0.0),
    }
    if p["has_shortcut"]:
        wsm = jnp.transpose(p["ws"][:, :, 0, 0], (1, 0))          # (Cin, Cout)
        pp["wsm"] = jnp.pad(wsm, ((0, 0), (0, cp - cout))).astype(jnp.bfloat16)
        pp["gs"] = pad_vec(p["gs"], 1.0)
        pp["bs"] = pad_vec(p["bs"], 0.0)
    return pp


def basic_block_forward(x_nchw, pp):
    """Equivalent of BasicBlock.forward(x) (training-mode BatchNorm stats)."""
    s = pp["stride"]
    x = jnp.transpose(x_nchw, (0, 2, 3, 1)).astype(jnp.float32)   # NCHW -> NHWC
    N, H, W, Cin = x.shape
    Cout, Cp = pp["cout"], pp["cp"]
    Ho = (H - 1) // s + 1
    Wo = (W - 1) // s + 1
    count = float(N * Ho * Wo)
    has_sc = pp["has_shortcut"]

    phases = _polyphase(x.astype(jnp.bfloat16), s, Ho, Wo)
    _, nph, R, Rw, _ = phases.shape

    # ---- kernel A: conv1 (+ fused 1x1 shortcut conv) + BN partial stats ----
    kernel_a = functools.partial(_conv1_kernel, stride=s, Ho=Ho, Wo=Wo,
                                 has_sc=has_sc)
    in_specs = [
        pl.BlockSpec((1, nph, R, Rw, Cin), lambda n: (n, 0, 0, 0, 0)),
        pl.BlockSpec((9, Cin, Cp), lambda n: (0, 0, 0)),
    ]
    inputs = [phases, pp["w1m"]]
    out_shape = [jax.ShapeDtypeStruct((N, Ho, Wo, Cp), jnp.float32),
                 jax.ShapeDtypeStruct((N, 2, Cp), jnp.float32)]
    out_specs = [pl.BlockSpec((1, Ho, Wo, Cp), lambda n: (n, 0, 0, 0)),
                 pl.BlockSpec((1, 2, Cp), lambda n: (n, 0, 0))]
    if has_sc:
        in_specs.append(pl.BlockSpec((Cin, Cp), lambda n: (0, 0)))
        inputs.append(pp["wsm"])
        out_shape += [jax.ShapeDtypeStruct((N, Ho, Wo, Cp), jnp.float32),
                      jax.ShapeDtypeStruct((N, 2, Cp), jnp.float32)]
        out_specs += [pl.BlockSpec((1, Ho, Wo, Cp), lambda n: (n, 0, 0, 0)),
                      pl.BlockSpec((1, 2, Cp), lambda n: (n, 0, 0))]

    outs = pl.pallas_call(
        kernel_a, grid=(N,), in_specs=in_specs, out_specs=out_specs,
        out_shape=out_shape, compiler_params=_compiler_params(),
    )(*inputs)

    if has_sc:
        y1, st1, ysc, stsc = outs
    else:
        y1, st1 = outs

    scale1, shift1 = _finalize_bn(st1, pp["g1"], pp["b1"], count)

    # ---- kernel B: bn1 + relu + conv2 + BN partial stats -------------------
    kernel_b = functools.partial(_conv2_kernel, Ho=Ho, Wo=Wo)
    y2, st2 = pl.pallas_call(
        kernel_b, grid=(N,),
        in_specs=[pl.BlockSpec((1, Ho, Wo, Cp), lambda n: (n, 0, 0, 0)),
                  pl.BlockSpec((1, Cp), lambda n: (0, 0)),
                  pl.BlockSpec((1, Cp), lambda n: (0, 0)),
                  pl.BlockSpec((9, Cp, Cp), lambda n: (0, 0, 0))],
        out_specs=[pl.BlockSpec((1, Ho, Wo, Cp), lambda n: (n, 0, 0, 0)),
                   pl.BlockSpec((1, 2, Cp), lambda n: (n, 0, 0))],
        out_shape=[jax.ShapeDtypeStruct((N, Ho, Wo, Cp), jnp.float32),
                   jax.ShapeDtypeStruct((N, 2, Cp), jnp.float32)],
        scratch_shapes=[pltpu.VMEM((Ho + 2, Wo + 2, Cp), jnp.float32)],
        compiler_params=_compiler_params(),
    )(y1, scale1, shift1, pp["w2m"])

    scale2, shift2 = _finalize_bn(st2, pp["g2"], pp["b2"], count)

    if has_sc:
        sc = ysc
        scale_s, shift_s = _finalize_bn(stsc, pp["gs"], pp["bs"], count)
    else:
        sc = jnp.pad(x, ((0, 0), (0, 0), (0, 0), (0, Cp - Cin)))   # identity
        scale_s = jnp.ones((1, Cp), jnp.float32)
        shift_s = jnp.zeros((1, Cp), jnp.float32)

    # ---- kernel C: bn2 + shortcut-BN + add + relu --------------------------
    out = pl.pallas_call(
        _bn_add_relu_kernel, grid=(N,),
        in_specs=[pl.BlockSpec((1, Ho, Wo, Cp), lambda n: (n, 0, 0, 0)),
                  pl.BlockSpec((1, Ho, Wo, Cp), lambda n: (n, 0, 0, 0)),
                  pl.BlockSpec((1, Cp), lambda n: (0, 0)),
                  pl.BlockSpec((1, Cp), lambda n: (0, 0)),
                  pl.BlockSpec((1, Cp), lambda n: (0, 0)),
                  pl.BlockSpec((1, Cp), lambda n: (0, 0))],
        out_specs=pl.BlockSpec((1, Ho, Wo, Cp), lambda n: (n, 0, 0, 0)),
        out_shape=jax.ShapeDtypeStruct((N, Ho, Wo, Cp), jnp.float32),
        compiler_params=_compiler_params(),
    )(y2, sc, scale2, shift2, scale_s, shift_s)

    out = out[..., :Cout]                                   # drop lane padding
    return jnp.transpose(out, (0, 3, 1, 2))                 # NHWC -> NCHW


# ------------------------- pure-JAX reference check --------------------------

def _reference_forward(x_nchw, p):
    """f32 reference on the same bf16-rounded conv operands the kernels use."""
    r = lambda a: a.astype(jnp.bfloat16).astype(jnp.float32)
    x = x_nchw.astype(jnp.float32)

    def conv(inp, w, stride, pad):
        return jax.lax.conv_general_dilated(
            r(inp), r(w), (stride, stride), ((pad, pad), (pad, pad)),
            dimension_numbers=("NCHW", "OIHW", "NCHW"),
            precision=jax.lax.Precision.HIGHEST)

    def bn(y, g, b):
        mean = jnp.mean(y, axis=(0, 2, 3), keepdims=True)
        var = jnp.mean(jnp.square(y - mean), axis=(0, 2, 3), keepdims=True)
        return ((y - mean) * jax.lax.rsqrt(var + EPS) * g.reshape(1, -1, 1, 1)
                + b.reshape(1, -1, 1, 1))

    s = p["stride"]
    o1 = jnp.maximum(bn(conv(x, p["w1"], s, 1), p["g1"], p["b1"]), 0.0)
    out = bn(conv(o1, p["w2"], 1, 1), p["g2"], p["b2"])
    if p["has_shortcut"]:
        out = out + bn(conv(x, p["ws"], s, 0), p["gs"], p["bs"])
    else:
        out = out + x
    return jnp.maximum(out, 0.0)


# ----------------------------------- main ------------------------------------

if __name__ == "__main__":
    key = jax.random.PRNGKey(0)
    kx1, kx2, kp1, kp2 = jax.random.split(key, 4)

    # Config 1: downsampling block (stride=2, channel change) -> conv shortcut.
    x = jax.random.normal(kx1, (2, 4, 16, 16), jnp.float32)
    raw1 = init_basic_block_params(kp1, in_planes=4, planes=8, stride=2, wide=1)
    pp1 = prepare_basic_block_params(raw1)
    fwd1 = jax.jit(lambda a: basic_block_forward(a, pp1))
    y = jax.block_until_ready(fwd1(x))
    assert y.shape == (2, 8, 8, 8), y.shape
    err1 = float(jnp.max(jnp.abs(y - _reference_forward(x, raw1))))
    assert err1 < 1e-2, f"config1 max abs err {err1}"

    # Config 2: identity-shortcut block (stride=1, same channels).
    x2 = jax.random.normal(kx2, (2, 8, 16, 16), jnp.float32)
    raw2 = init_basic_block_params(kp2, in_planes=8, planes=8, stride=1, wide=1)
    pp2 = prepare_basic_block_params(raw2)
    fwd2 = jax.jit(lambda a: basic_block_forward(a, pp2))
    y2 = jax.block_until_ready(fwd2(x2))
    assert y2.shape == (2, 8, 16, 16), y2.shape
    err2 = float(jnp.max(jnp.abs(y2 - _reference_forward(x2, raw2))))
    assert err2 < 1e-2, f"config2 max abs err {err2}"

    print("KERNEL_OK")
</pallas_src>

<mosaic_0001>
module attributes {stable_mosaic.version = 11 : i64} {
  func.func @_conv1_kernel(%arg0: i32, %arg1: memref<1x4x9x9x4xbf16, #tpu.memory_space<vmem>>, %arg2: memref<9x4x128xbf16, #tpu.memory_space<vmem>>, %arg3: memref<4x128xbf16, #tpu.memory_space<vmem>>, %arg4: memref<1x8x8x128xf32, #tpu.memory_space<vmem>>, %arg5: memref<1x2x128xf32, #tpu.memory_space<vmem>>, %arg6: memref<1x8x8x128xf32, #tpu.memory_space<vmem>>, %arg7: memref<1x2x128xf32, #tpu.memory_space<vmem>>) attributes {dimension_semantics = [#tpu.dimension_semantics<parallel>], iteration_bounds = array<i64: 2>, scalar_prefetch = 0 : i64, scratch_operands = 0 : i64, tpu.core_type = #tpu.core_type<tc>, window_params = [{transform_indices = @transform_0, window_bounds = array<i64: 1, 4, 9, 9, 4>}, {pipeline_mode = #tpu.pipeline_mode<synchronous>, transform_indices = @transform_1, window_bounds = array<i64: 9, 4, 128>}, {pipeline_mode = #tpu.pipeline_mode<synchronous>, transform_indices = @transform_2, window_bounds = array<i64: 4, 128>}, {transform_indices = @transform_3, window_bounds = array<i64: 1, 8, 8, 128>}, {transform_indices = @transform_4, window_bounds = array<i64: 1, 2, 128>}, {transform_indices = @transform_5, window_bounds = array<i64: 1, 8, 8, 128>}, {transform_indices = @transform_6, window_bounds = array<i64: 1, 2, 128>}]} {
    %c0 = arith.constant 0 : index
    %c0_0 = arith.constant 0 : index
    %c0_1 = arith.constant 0 : index
    %c0_2 = arith.constant 0 : index
    %c0_3 = arith.constant 0 : index
    %0 = vector.load %arg1[%c0, %c0_0, %c0_1, %c0_2, %c0_3] : memref<1x4x9x9x4xbf16, #tpu.memory_space<vmem>>, vector<1x1x9x9x4xbf16>
    %1 = vector.shape_cast %0 : vector<1x1x9x9x4xbf16> to vector<9x9x4xbf16>
    %c0_4 = arith.constant 0 : index
    %c1 = arith.constant 1 : index
    %c0_5 = arith.constant 0 : index
    %c0_6 = arith.constant 0 : index
    %c0_7 = arith.constant 0 : index
    %2 = vector.load %arg1[%c0_4, %c1, %c0_5, %c0_6, %c0_7] : memref<1x4x9x9x4xbf16, #tpu.memory_space<vmem>>, vector<1x1x9x9x4xbf16>
    %3 = vector.shape_cast %2 : vector<1x1x9x9x4xbf16> to vector<9x9x4xbf16>
    %c0_8 = arith.constant 0 : index
    %c2 = arith.constant 2 : index
    %c0_9 = arith.constant 0 : index
    %c0_10 = arith.constant 0 : index
    %c0_11 = arith.constant 0 : index
    %4 = vector.load %arg1[%c0_8, %c2, %c0_9, %c0_10, %c0_11] : memref<1x4x9x9x4xbf16, #tpu.memory_space<vmem>>, vector<1x1x9x9x4xbf16>
    %5 = vector.shape_cast %4 : vector<1x1x9x9x4xbf16> to vector<9x9x4xbf16>
    %c0_12 = arith.constant 0 : index
    %c3 = arith.constant 3 : index
    %c0_13 = arith.constant 0 : index
    %c0_14 = arith.constant 0 : index
    %c0_15 = arith.constant 0 : index
    %6 = vector.load %arg1[%c0_12, %c3, %c0_13, %c0_14, %c0_15] : memref<1x4x9x9x4xbf16, #tpu.memory_space<vmem>>, vector<1x1x9x9x4xbf16>
    %7 = vector.shape_cast %6 : vector<1x1x9x9x4xbf16> to vector<9x9x4xbf16>
    %cst = arith.constant 0.000000e+00 : f32
    %8 = vector.broadcast %cst : f32 to vector<64x128xf32>
    %9 = vector.extract_strided_slice %1 {offsets = [0, 0, 0], sizes = [8, 8, 4], strides = [1, 1, 1]} : vector<9x9x4xbf16> to vector<8x8x4xbf16>
    %10 = vector.shape_cast %9 : vector<8x8x4xbf16> to vector<64x4xbf16>
    %c0_16 = arith.constant 0 : index
    %c0_17 = arith.constant 0 : index
    %c0_18 = arith.constant 0 : index
    %11 = vector.load %arg2[%c0_16, %c0_17, %c0_18] : memref<9x4x128xbf16, #tpu.memory_space<vmem>>, vector<1x4x128xbf16>
    %12 = vector.shape_cast %11 : vector<1x4x128xbf16> to vector<4x128xbf16>
    %cst_19 = arith.constant dense<0.000000e+00> : vector<64x128xf32>
    %13 = tpu.matmul %10, %12, %cst_19 {dimension_numbers = #tpu.dot_dimension_numbers<[1], [0], [0], [1], [0, 0, 1, 1], [], []>} : vector<64x4xbf16>, vector<4x128xbf16>, vector<64x128xf32> -> vector<64x128xf32>
    %14 = arith.addf %8, %13 : vector<64x128xf32>
    %15 = vector.extract_strided_slice %3 {offsets = [0, 0, 0], sizes = [8, 8, 4], strides = [1, 1, 1]} : vector<9x9x4xbf16> to vector<8x8x4xbf16>
    %16 = vector.shape_cast %15 : vector<8x8x4xbf16> to vector<64x4xbf16>
    %c1_20 = arith.constant 1 : index
    %c0_21 = arith.constant 0 : index
    %c0_22 = arith.constant 0 : index
    %17 = vector.load %arg2[%c1_20, %c0_21, %c0_22] : memref<9x4x128xbf16, #tpu.memory_space<vmem>>, vector<1x4x128xbf16>
    %18 = vector.shape_cast %17 : vector<1x4x128xbf16> to vector<4x128xbf16>
    %cst_23 = arith.constant dense<0.000000e+00> : vector<64x128xf32>
    %19 = tpu.matmul %16, %18, %cst_23 {dimension_numbers = #tpu.dot_dimension_numbers<[1], [0], [0], [1], [0, 0, 1, 1], [], []>} : vector<64x4xbf16>, vector<4x128xbf16>, vector<64x128xf32> -> vector<64x128xf32>
    %20 = arith.addf %14, %19 : vector<64x128xf32>
    %21 = vector.extract_strided_slice %1 {offsets = [0, 1, 0], sizes = [8, 8, 4], strides = [1, 1, 1]} : vector<9x9x4xbf16> to vector<8x8x4xbf16>
    %22 = vector.shape_cast %21 : vector<8x8x4xbf16> to vector<64x4xbf16>
    %c2_24 = arith.constant 2 : index
    %c0_25 = arith.constant 0 : index
    %c0_26 = arith.constant 0 : index
    %23 = vector.load %arg2[%c2_24, %c0_25, %c0_26] : memref<9x4x128xbf16, #tpu.memory_space<vmem>>, vector<1x4x128xbf16>
    %24 = vector.shape_cast %23 : vector<1x4x128xbf16> to vector<4x128xbf16>
    %cst_27 = arith.constant dense<0.000000e+00> : vector<64x128xf32>
    %25 = tpu.matmul %22, %24, %cst_27 {dimension_numbers = #tpu.dot_dimension_numbers<[1], [0], [0], [1], [0, 0, 1, 1], [], []>} : vector<64x4xbf16>, vector<4x128xbf16>, vector<64x128xf32> -> vector<64x128xf32>
    %26 = arith.addf %20, %25 : vector<64x128xf32>
    %27 = vector.extract_strided_slice %5 {offsets = [0, 0, 0], sizes = [8, 8, 4], strides = [1, 1, 1]} : vector<9x9x4xbf16> to vector<8x8x4xbf16>
    %28 = vector.shape_cast %27 : vector<8x8x4xbf16> to vector<64x4xbf16>
    %c3_28 = arith.constant 3 : index
    %c0_29 = arith.constant 0 : index
    %c0_30 = arith.constant 0 : index
    %29 = vector.load %arg2[%c3_28, %c0_29, %c0_30] : memref<9x4x128xbf16, #tpu.memory_space<vmem>>, vector<1x4x128xbf16>
    %30 = vector.shape_cast %29 : vector<1x4x128xbf16> to vector<4x128xbf16>
    %cst_31 = arith.constant dense<0.000000e+00> : vector<64x128xf32>
    %31 = tpu.matmul %28, %30, %cst_31 {dimension_numbers = #tpu.dot_dimension_numbers<[1], [0], [0], [1], [0, 0, 1, 1], [], []>} : vector<64x4xbf16>, vector<4x128xbf16>, vector<64x128xf32> -> vector<64x128xf32>
    %32 = arith.addf %26, %31 : vector<64x128xf32>
    %33 = vector.extract_strided_slice %7 {offsets = [0, 0, 0], sizes = [8, 8, 4], strides = [1, 1, 1]} : vector<9x9x4xbf16> to vector<8x8x4xbf16>
    %34 = vector.shape_cast %33 : vector<8x8x4xbf16> to vector<64x4xbf16>
    %c4 = arith.constant 4 : index
    %c0_32 = arith.constant 0 : index
    %c0_33 = arith.constant 0 : index
    %35 = vector.load %arg2[%c4, %c0_32, %c0_33] : memref<9x4x128xbf16, #tpu.memory_space<vmem>>, vector<1x4x128xbf16>
    %36 = vector.shape_cast %35 : vector<1x4x128xbf16> to vector<4x128xbf16>
    %cst_34 = arith.constant dense<0.000000e+00> : vector<64x128xf32>
    %37 = tpu.matmul %34, %36, %cst_34 {dimension_numbers = #tpu.dot_dimension_numbers<[1], [0], [0], [1], [0, 0, 1, 1], [], []>} : vector<64x4xbf16>, vector<4x128xbf16>, vector<64x128xf32> -> vector<64x128xf32>
    %38 = arith.addf %32, %37 : vector<64x128xf32>
    %39 = vector.extract_strided_slice %5 {offsets = [0, 1, 0], sizes = [8, 8, 4], strides = [1, 1, 1]} : vector<9x9x4xbf16> to vector<8x8x4xbf16>
    %40 = vector.shape_cast %39 : vector<8x8x4xbf16> to vector<64x4xbf16>
    %c5 = arith.constant 5 : index
    %c0_35 = arith.constant 0 : index
    %c0_36 = arith.constant 0 : index
    %41 = vector.load %arg2[%c5, %c0_35, %c0_36] : memref<9x4x128xbf16, #tpu.memory_space<vmem>>, vector<1x4x128xbf16>
    %42 = vector.shape_cast %41 : vector<1x4x128xbf16> to vector<4x128xbf16>
    %cst_37 = arith.constant dense<0.000000e+00> : vector<64x128xf32>
    %43 = tpu.matmul %40, %42, %cst_37 {dimension_numbers = #tpu.dot_dimension_numbers<[1], [0], [0], [1], [0, 0, 1, 1], [], []>} : vector<64x4xbf16>, vector<4x128xbf16>, vector<64x128xf32> -> vector<64x128xf32>
    %44 = arith.addf %38, %43 : vector<64x128xf32>
    %45 = vector.extract_strided_slice %1 {offsets = [1, 0, 0], sizes = [8, 8, 4], strides = [1, 1, 1]} : vector<9x9x4xbf16> to vector<8x8x4xbf16>
    %46 = vector.shape_cast %45 : vector<8x8x4xbf16> to vector<64x4xbf16>
    %c6 = arith.constant 6 : index
    %c0_38 = arith.constant 0 : index
    %c0_39 = arith.constant 0 : index
    %47 = vector.load %arg2[%c6, %c0_38, %c0_39] : memref<9x4x128xbf16, #tpu.memory_space<vmem>>, vector<1x4x128xbf16>
    %48 = vector.shape_cast %47 : vector<1x4x128xbf16> to vector<4x128xbf16>
    %cst_40 = arith.constant dense<0.000000e+00> : vector<64x128xf32>
    %49 = tpu.matmul %46, %48, %cst_40 {dimension_numbers = #tpu.dot_dimension_numbers<[1], [0], [0], [1], [0, 0, 1, 1], [], []>} : vector<64x4xbf16>, vector<4x128xbf16>, vector<64x128xf32> -> vector<64x128xf32>
    %50 = arith.addf %44, %49 : vector<64x128xf32>
    %51 = vector.extract_strided_slice %3 {offsets = [1, 0, 0], sizes = [8, 8, 4], strides = [1, 1, 1]} : vector<9x9x4xbf16> to vector<8x8x4xbf16>
    %52 = vector.shape_cast %51 : vector<8x8x4xbf16> to vector<64x4xbf16>
    %c7 = arith.constant 7 : index
    %c0_41 = arith.constant 0 : index
    %c0_42 = arith.constant 0 : index
    %53 = vector.load %arg2[%c7, %c0_41, %c0_42] : memref<9x4x128xbf16, #tpu.memory_space<vmem>>, vector<1x4x128xbf16>
    %54 = vector.shape_cast %53 : vector<1x4x128xbf16> to vector<4x128xbf16>
    %cst_43 = arith.constant dense<0.000000e+00> : vector<64x128xf32>
    %55 = tpu.matmul %52, %54, %cst_43 {dimension_numbers = #tpu.dot_dimension_numbers<[1], [0], [0], [1], [0, 0, 1, 1], [], []>} : vector<64x4xbf16>, vector<4x128xbf16>, vector<64x128xf32> -> vector<64x128xf32>
    %56 = arith.addf %50, %55 : vector<64x128xf32>
    %57 = vector.extract_strided_slice %1 {offsets = [1, 1, 0], sizes = [8, 8, 4], strides = [1, 1, 1]} : vector<9x9x4xbf16> to vector<8x8x4xbf16>
    %58 = vector.shape_cast %57 : vector<8x8x4xbf16> to vector<64x4xbf16>
    %c8 = arith.constant 8 : index
    %c0_44 = arith.constant 0 : index
    %c0_45 = arith.constant 0 : index
    %59 = vector.load %arg2[%c8, %c0_44, %c0_45] : memref<9x4x128xbf16, #tpu.memory_space<vmem>>, vector<1x4x128xbf16>
    %60 = vector.shape_cast %59 : vector<1x4x128xbf16> to vector<4x128xbf16>
    %cst_46 = arith.constant dense<0.000000e+00> : vector<64x128xf32>
    %61 = tpu.matmul %58, %60, %cst_46 {dimension_numbers = #tpu.dot_dimension_numbers<[1], [0], [0], [1], [0, 0, 1, 1], [], []>} : vector<64x4xbf16>, vector<4x128xbf16>, vector<64x128xf32> -> vector<64x128xf32>
    %62 = arith.addf %56, %61 : vector<64x128xf32>
    %63 = vector.shape_cast %62 : vector<64x128xf32> to vector<1x8x8x128xf32>
    %c0_47 = arith.constant 0 : index
    %c0_48 = arith.constant 0 : index
    %c0_49 = arith.constant 0 : index
    %c0_50 = arith.constant 0 : index
    %64 = vector.load %arg4[%c0_47, %c0_48, %c0_49, %c0_50] : memref<1x8x8x128xf32, #tpu.memory_space<vmem>>, vector<1x8x8x128xf32>
    tpu.vector_store %arg4[%c0_47, %c0_48, %c0_49, %c0_50], %63 {strides = array<i32>} : memref<1x8x8x128xf32, #tpu.memory_space<vmem>>, vector<1x8x8x128xf32>,
    %cst_51 = arith.constant dense<0.000000e+00> : vector<128xf32>
    %65 = vector.multi_reduction <add>, %62, %cst_51 [0] : vector<64x128xf32> to vector<128xf32>
    %66 = vector.shape_cast %65 : vector<128xf32> to vector<1x128xf32>
    %67 = arith.mulf %62, %62 : vector<64x128xf32>
    %cst_52 = arith.constant dense<0.000000e+00> : vector<128xf32>
    %68 = vector.multi_reduction <add>, %67, %cst_52 [0] : vector<64x128xf32> to vector<128xf32>
    %69 = vector.shape_cast %68 : vector<128xf32> to vector<1x128xf32>
    %70 = tpu.concatenate %66, %69 in 0 : vector<1x128xf32>, vector<1x128xf32> -> vector<2x128xf32>
    %71 = vector.shape_cast %70 : vector<2x128xf32> to vector<1x2x128xf32>
    %c0_53 = arith.constant 0 : index
    %c0_54 = arith.constant 0 : index
    %c0_55 = arith.constant 0 : index
    %72 = vector.load %arg5[%c0_53, %c0_54, %c0_55] : memref<1x2x128xf32, #tpu.memory_space<vmem>>, vector<1x2x128xf32>
    tpu.vector_store %arg5[%c0_53, %c0_54, %c0_55], %71 {strides = array<i32>} : memref<1x2x128xf32, #tpu.memory_space<vmem>>, vector<1x2x128xf32>,
    %73 = vector.extract_strided_slice %7 {offsets = [0, 0, 0], sizes = [8, 8, 4], strides = [1, 1, 1]} : vector<9x9x4xbf16> to vector<8x8x4xbf16>
    %74 = vector.shape_cast %73 : vector<8x8x4xbf16> to vector<64x4xbf16>
    %c0_56 = arith.constant 0 : index
    %c0_57 = arith.constant 0 : index
    %75 = vector.load %arg3[%c0_56, %c0_57] : memref<4x128xbf16, #tpu.memory_space<vmem>>, vector<4x128xbf16>
    %cst_58 = arith.constant dense<0.000000e+00> : vector<64x128xf32>
    %76 = tpu.matmul %74, %75, %cst_58 {dimension_numbers = #tpu.dot_dimension_numbers<[1], [0], [0], [1], [0, 0, 1, 1], [], []>} : vector<64x4xbf16>, vector<4x128xbf16>, vector<64x128xf32> -> vector<64x128xf32>
    %77 = vector.shape_cast %76 : vector<64x128xf32> to vector<1x8x8x128xf32>
    %c0_59 = arith.constant 0 : index
    %c0_60 = arith.constant 0 : index
    %c0_61 = arith.constant 0 : index
    %c0_62 = arith.constant 0 : index
    %78 = vector.load %arg6[%c0_59, %c0_60, %c0_61, %c0_62] : memref<1x8x8x128xf32, #tpu.memory_space<vmem>>, vector<1x8x8x128xf32>
    tpu.vector_store %arg6[%c0_59, %c0_60, %c0_61, %c0_62], %77 {strides = array<i32>} : memref<1x8x8x128xf32, #tpu.memory_space<vmem>>, vector<1x8x8x128xf32>,
    %cst_63 = arith.constant dense<0.000000e+00> : vector<128xf32>
    %79 = vector.multi_reduction <add>, %76, %cst_63 [0] : vector<64x128xf32> to vector<128xf32>
    %80 = vector.shape_cast %79 : vector<128xf32> to vector<1x128xf32>
    %81 = arith.mulf %76, %76 : vector<64x128xf32>
    %cst_64 = arith.constant dense<0.000000e+00> : vector<128xf32>
    %82 = vector.multi_reduction <add>, %81, %cst_64 [0] : vector<64x128xf32> to vector<128xf32>
    %83 = vector.shape_cast %82 : vector<128xf32> to vector<1x128xf32>
    %84 = tpu.concatenate %80, %83 in 0 : vector<1x128xf32>, vector<1x128xf32> -> vector<2x128xf32>
    %85 = vector.shape_cast %84 : vector<2x128xf32> to vector<1x2x128xf32>
    %c0_65 = arith.constant 0 : index
    %c0_66 = arith.constant 0 : index
    %c0_67 = arith.constant 0 : index
    %86 = vector.load %arg7[%c0_65, %c0_66, %c0_67] : memref<1x2x128xf32, #tpu.memory_space<vmem>>, vector<1x2x128xf32>
    tpu.vector_store %arg7[%c0_65, %c0_66, %c0_67], %85 {strides = array<i32>} : memref<1x2x128xf32, #tpu.memory_space<vmem>>, vector<1x2x128xf32>,
    return
  }
  func.func @transform_0(%arg0: i32) -> (i32, i32, i32, i32, i32) {
    %c0_i32 = arith.constant 0 : i32
    %c0_i32_0 = arith.constant 0 : i32
    %c0_i32_1 = arith.constant 0 : i32
    %c0_i32_2 = arith.constant 0 : i32
    %c0_i32_3 = arith.constant 0 : i32
    return %arg0, %c0_i32, %c0_i32_0, %c0_i32_1, %c0_i32_2 : i32, i32, i32, i32, i32
  }
  func.func @transform_1(%arg0: i32) -> (i32, i32, i32) {
    %c0_i32 = arith.constant 0 : i32
    %c0_i32_0 = arith.constant 0 : i32
    %c0_i32_1 = arith.constant 0 : i32
    %c0_i32_2 = arith.constant 0 : i32
    return %c0_i32, %c0_i32_0, %c0_i32_1 : i32, i32, i32
  }
  func.func @transform_2(%arg0: i32) -> (i32, i32) {
    %c0_i32 = arith.constant 0 : i32
    %c0_i32_0 = arith.constant 0 : i32
    %c0_i32_1 = arith.constant 0 : i32
    return %c0_i32, %c0_i32_0 : i32, i32
  }
  func.func @transform_3(%arg0: i32) -> (i32, i32, i32, i32) {
    %c0_i32 = arith.constant 0 : i32
    %c0_i32_0 = arith.constant 0 : i32
    %c0_i32_1 = arith.constant 0 : i32
    %c0_i32_2 = arith.constant 0 : i32
    return %arg0, %c0_i32, %c0_i32_0, %c0_i32_1 : i32, i32, i32, i32
  }
  func.func @transform_4(%arg0: i32) -> (i32, i32, i32) {
    %c0_i32 = arith.constant 0 : i32
    %c0_i32_0 = arith.constant 0 : i32
    %c0_i32_1 = arith.constant 0 : i32
    return %arg0, %c0_i32, %c0_i32_0 : i32, i32, i32
  }
  func.func @transform_5(%arg0: i32) -> (i32, i32, i32, i32) {
    %c0_i32 = arith.constant 0 : i32
    %c0_i32_0 = arith.constant 0 : i32
    %c0_i32_1 = arith.constant 0 : i32
    %c0_i32_2 = arith.constant 0 : i32
    return %arg0, %c0_i32, %c0_i32_0, %c0_i32_1 : i32, i32, i32, i32
  }
  func.func @transform_6(%arg0: i32) -> (i32, i32, i32) {
    %c0_i32 = arith.constant 0 : i32
    %c0_i32_0 = arith.constant 0 : i32
    %c0_i32_1 = arith.constant 0 : i32
    return %arg0, %c0_i32, %c0_i32_0 : i32, i32, i32
  }
}

module attributes {stable_mosaic.version = 11 : i64} {
  func.func @_conv2_kernel(%arg0: i32, %arg1: memref<1x8x8x128xf32, #tpu.memory_space<vmem>>, %arg2: memref<1x128xf32, #tpu.memory_space<vmem>>, %arg3: memref<1x128xf32, #tpu.memory_space<vmem>>, %arg4: memref<9x128x128xbf16, #tpu.memory_space<vmem>>, %arg5: memref<1x8x8x128xf32, #tpu.memory_space<vmem>>, %arg6: memref<1x2x128xf32, #tpu.memory_space<vmem>>, %arg7: memref<10x10x128xf32, #tpu.memory_space<vmem>>) attributes {dimension_semantics = [#tpu.dimension_semantics<parallel>], iteration_bounds = array<i64: 2>, scalar_prefetch = 0 : i64, scratch_operands = 1 : i64, tpu.core_type = #tpu.core_type<tc>, window_params = [{transform_indices = @transform_0, window_bounds = array<i64: 1, 8, 8, 128>}, {pipeline_mode = #tpu.pipeline_mode<synchronous>, transform_indices = @transform_1, window_bounds = array<i64: 1, 128>}, {pipeline_mode = #tpu.pipeline_mode<synchronous>, transform_indices = @transform_2, window_bounds = array<i64: 1, 128>}, {pipeline_mode = #tpu.pipeline_mode<synchronous>, transform_indices = @transform_3, window_bounds = array<i64: 9, 128, 128>}, {transform_indices = @transform_4, window_bounds = array<i64: 1, 8, 8, 128>}, {transform_indices = @transform_5, window_bounds = array<i64: 1, 2, 128>}]} {
    %c0 = arith.constant 0 : index
    %c0_0 = arith.constant 0 : index
    %0 = vector.load %arg2[%c0, %c0_0] : memref<1x128xf32, #tpu.memory_space<vmem>>, vector<1x128xf32>
    %1 = vector.shape_cast %0 : vector<1x128xf32> to vector<1x1x128xf32>
    %c0_1 = arith.constant 0 : index
    %c0_2 = arith.constant 0 : index
    %2 = vector.load %arg3[%c0_1, %c0_2] : memref<1x128xf32, #tpu.memory_space<vmem>>, vector<1x128xf32>
    %3 = vector.shape_cast %2 : vector<1x128xf32> to vector<1x1x128xf32>
    %c0_3 = arith.constant 0 : index
    %c0_4 = arith.constant 0 : index
    %c0_5 = arith.constant 0 : index
    %c0_6 = arith.constant 0 : index
    %4 = vector.load %arg1[%c0_3, %c0_4, %c0_5, %c0_6] : memref<1x8x8x128xf32, #tpu.memory_space<vmem>>, vector<1x8x8x128xf32>
    %5 = vector.shape_cast %4 : vector<1x8x8x128xf32> to vector<8x8x128xf32>
    %6 = vector.broadcast %1 : vector<1x1x128xf32> to vector<8x8x128xf32>
    %7 = arith.mulf %5, %6 : vector<8x8x128xf32>
    %8 = vector.broadcast %3 : vector<1x1x128xf32> to vector<8x8x128xf32>
    %9 = arith.addf %7, %8 : vector<8x8x128xf32>
    %cst = arith.constant 0.000000e+00 : f32
    %10 = vector.broadcast %cst : f32 to vector<8x8x128xf32>
    %11 = arith.maximumf %9, %10 : vector<8x8x128xf32>
    %cst_7 = arith.constant 0.000000e+00 : f32
    %12 = vector.broadcast %cst_7 : f32 to vector<10x10x128xf32>
    %c0_8 = arith.constant 0 : index
    %c0_9 = arith.constant 0 : index
    %c0_10 = arith.constant 0 : index
    %13 = vector.load %arg7[%c0_8, %c0_9, %c0_10] : memref<10x10x128xf32, #tpu.memory_space<vmem>>, vector<10x10x128xf32>
    tpu.vector_store %arg7[%c0_8, %c0_9, %c0_10], %12 {strides = array<i32>} : memref<10x10x128xf32, #tpu.memory_space<vmem>>, vector<10x10x128xf32>,
    %c1 = arith.constant 1 : index
    %c1_11 = arith.constant 1 : index
    %c0_12 = arith.constant 0 : index
    %14 = vector.load %arg7[%c1, %c1_11, %c0_12] : memref<10x10x128xf32, #tpu.memory_space<vmem>>, vector<8x8x128xf32>
    tpu.vector_store %arg7[%c1, %c1_11, %c0_12], %11 {strides = array<i32>} : memref<10x10x128xf32, #tpu.memory_space<vmem>>, vector<8x8x128xf32>,
    %cst_13 = arith.constant 0.000000e+00 : f32
    %15 = vector.broadcast %cst_13 : f32 to vector<64x128xf32>
    %c0_14 = arith.constant 0 : index
    %c0_15 = arith.constant 0 : index
    %c0_16 = arith.constant 0 : index
    %16 = vector.load %arg7[%c0_14, %c0_15, %c0_16] : memref<10x10x128xf32, #tpu.memory_space<vmem>>, vector<8x8x128xf32>
    %17 = vector.shape_cast %16 : vector<8x8x128xf32> to vector<64x128xf32>
    %18 = arith.truncf %17 : vector<64x128xf32> to vector<64x128xbf16>
    %c0_17 = arith.constant 0 : index
    %c0_18 = arith.constant 0 : index
    %c0_19 = arith.constant 0 : index
    %19 = vector.load %arg4[%c0_17, %c0_18, %c0_19] : memref<9x128x128xbf16, #tpu.memory_space<vmem>>, vector<1x128x128xbf16>
    %20 = vector.shape_cast %19 : vector<1x128x128xbf16> to vector<128x128xbf16>
    %cst_20 = arith.constant dense<0.000000e+00> : vector<64x128xf32>
    %21 = tpu.matmul %18, %20, %cst_20 {dimension_numbers = #tpu.dot_dimension_numbers<[1], [0], [0], [1], [0, 0, 1, 1], [], []>} : vector<64x128xbf16>, vector<128x128xbf16>, vector<64x128xf32> -> vector<64x128xf32>
    %22 = arith.addf %15, %21 : vector<64x128xf32>
    %c0_21 = arith.constant 0 : index
    %c1_22 = arith.constant 1 : index
    %c0_23 = arith.constant 0 : index
    %23 = vector.load %arg7[%c0_21, %c1_22, %c0_23] : memref<10x10x128xf32, #tpu.memory_space<vmem>>, vector<8x8x128xf32>
    %24 = vector.shape_cast %23 : vector<8x8x128xf32> to vector<64x128xf32>
    %25 = arith.truncf %24 : vector<64x128xf32> to vector<64x128xbf16>
    %c1_24 = arith.constant 1 : index
    %c0_25 = arith.constant 0 : index
    %c0_26 = arith.constant 0 : index
    %26 = vector.load %arg4[%c1_24, %c0_25, %c0_26] : memref<9x128x128xbf16, #tpu.memory_space<vmem>>, vector<1x128x128xbf16>
    %27 = vector.shape_cast %26 : vector<1x128x128xbf16> to vector<128x128xbf16>
    %cst_27 = arith.constant dense<0.000000e+00> : vector<64x128xf32>
    %28 = tpu.matmul %25, %27, %cst_27 {dimension_numbers = #tpu.dot_dimension_numbers<[1], [0], [0], [1], [0, 0, 1, 1], [], []>} : vector<64x128xbf16>, vector<128x128xbf16>, vector<64x128xf32> -> vector<64x128xf32>
    %29 = arith.addf %22, %28 : vector<64x128xf32>
    %c0_28 = arith.constant 0 : index
    %c2 = arith.constant 2 : index
    %c0_29 = arith.constant 0 : index
    %30 = vector.load %arg7[%c0_28, %c2, %c0_29] : memref<10x10x128xf32, #tpu.memory_space<vmem>>, vector<8x8x128xf32>
    %31 = vector.shape_cast %30 : vector<8x8x128xf32> to vector<64x128xf32>
    %32 = arith.truncf %31 : vector<64x128xf32> to vector<64x128xbf16>
    %c2_30 = arith.constant 2 : index
    %c0_31 = arith.constant 0 : index
    %c0_32 = arith.constant 0 : index
    %33 = vector.load %arg4[%c2_30, %c0_31, %c0_32] : memref<9x128x128xbf16, #tpu.memory_space<vmem>>, vector<1x128x128xbf16>
    %34 = vector.shape_cast %33 : vector<1x128x128xbf16> to vector<128x128xbf16>
    %cst_33 = arith.constant dense<0.000000e+00> : vector<64x128xf32>
    %35 = tpu.matmul %32, %34, %cst_33 {dimension_numbers = #tpu.dot_dimension_numbers<[1], [0], [0], [1], [0, 0, 1, 1], [], []>} : vector<64x128xbf16>, vector<128x128xbf16>, vector<64x128xf32> -> vector<64x128xf32>
    %36 = arith.addf %29, %35 : vector<64x128xf32>
    %c1_34 = arith.constant 1 : index
    %c0_35 = arith.constant 0 : index
    %c0_36 = arith.constant 0 : index
    %37 = vector.load %arg7[%c1_34, %c0_35, %c0_36] : memref<10x10x128xf32, #tpu.memory_space<vmem>>, vector<8x8x128xf32>
    %38 = vector.shape_cast %37 : vector<8x8x128xf32> to vector<64x128xf32>
    %39 = arith.truncf %38 : vector<64x128xf32> to vector<64x128xbf16>
    %c3 = arith.constant 3 : index
    %c0_37 = arith.constant 0 : index
    %c0_38 = arith.constant 0 : index
    %40 = vector.load %arg4[%c3, %c0_37, %c0_38] : memref<9x128x128xbf16, #tpu.memory_space<vmem>>, vector<1x128x128xbf16>
    %41 = vector.shape_cast %40 : vector<1x128x128xbf16> to vector<128x128xbf16>
    %cst_39 = arith.constant dense<0.000000e+00> : vector<64x128xf32>
    %42 = tpu.matmul %39, %41, %cst_39 {dimension_numbers = #tpu.dot_dimension_numbers<[1], [0], [0], [1], [0, 0, 1, 1], [], []>} : vector<64x128xbf16>, vector<128x128xbf16>, vector<64x128xf32> -> vector<64x128xf32>
    %43 = arith.addf %36, %42 : vector<64x128xf32>
    %c1_40 = arith.constant 1 : index
    %c1_41 = arith.constant 1 : index
    %c0_42 = arith.constant 0 : index
    %44 = vector.load %arg7[%c1_40, %c1_41, %c0_42] : memref<10x10x128xf32, #tpu.memory_space<vmem>>, vector<8x8x128xf32>
    %45 = vector.shape_cast %44 : vector<8x8x128xf32> to vector<64x128xf32>
    %46 = arith.truncf %45 : vector<64x128xf32> to vector<64x128xbf16>
    %c4 = arith.constant 4 : index
    %c0_43 = arith.constant 0 : index
    %c0_44 = arith.constant 0 : index
    %47 = vector.load %arg4[%c4, %c0_43, %c0_44] : memref<9x128x128xbf16, #tpu.memory_space<vmem>>, vector<1x128x128xbf16>
    %48 = vector.shape_cast %47 : vector<1x128x128xbf16> to vector<128x128xbf16>
    %cst_45 = arith.constant dense<0.000000e+00> : vector<64x128xf32>
    %49 = tpu.matmul %46, %48, %cst_45 {dimension_numbers = #tpu.dot_dimension_numbers<[1], [0], [0], [1], [0, 0, 1, 1], [], []>} : vector<64x128xbf16>, vector<128x128xbf16>, vector<64x128xf32> -> vector<64x128xf32>
    %50 = arith.addf %43, %49 : vector<64x128xf32>
    %c1_46 = arith.constant 1 : index
    %c2_47 = arith.constant 2 : index
    %c0_48 = arith.constant 0 : index
    %51 = vector.load %arg7[%c1_46, %c2_47, %c0_48] : memref<10x10x128xf32, #tpu.memory_space<vmem>>, vector<8x8x128xf32>
    %52 = vector.shape_cast %51 : vector<8x8x128xf32> to vector<64x128xf32>
    %53 = arith.truncf %52 : vector<64x128xf32> to vector<64x128xbf16>
    %c5 = arith.constant 5 : index
    %c0_49 = arith.constant 0 : index
    %c0_50 = arith.constant 0 : index
    %54 = vector.load %arg4[%c5, %c0_49, %c0_50] : memref<9x128x128xbf16, #tpu.memory_space<vmem>>, vector<1x128x128xbf16>
    %55 = vector.shape_cast %54 : vector<1x128x128xbf16> to vector<128x128xbf16>
    %cst_51 = arith.constant dense<0.000000e+00> : vector<64x128xf32>
    %56 = tpu.matmul %53, %55, %cst_51 {dimension_numbers = #tpu.dot_dimension_numbers<[1], [0], [0], [1], [0, 0, 1, 1], [], []>} : vector<64x128xbf16>, vector<128x128xbf16>, vector<64x128xf32> -> vector<64x128xf32>
    %57 = arith.addf %50, %56 : vector<64x128xf32>
    %c2_52 = arith.constant 2 : index
    %c0_53 = arith.constant 0 : index
    %c0_54 = arith.constant 0 : index
    %58 = vector.load %arg7[%c2_52, %c0_53, %c0_54] : memref<10x10x128xf32, #tpu.memory_space<vmem>>, vector<8x8x128xf32>
    %59 = vector.shape_cast %58 : vector<8x8x128xf32> to vector<64x128xf32>
    %60 = arith.truncf %59 : vector<64x128xf32> to vector<64x128xbf16>
    %c6 = arith.constant 6 : index
    %c0_55 = arith.constant 0 : index
    %c0_56 = arith.constant 0 : index
    %61 = vector.load %arg4[%c6, %c0_55, %c0_56] : memref<9x128x128xbf16, #tpu.memory_space<vmem>>, vector<1x128x128xbf16>
    %62 = vector.shape_cast %61 : vector<1x128x128xbf16> to vector<128x128xbf16>
    %cst_57 = arith.constant dense<0.000000e+00> : vector<64x128xf32>
    %63 = tpu.matmul %60, %62, %cst_57 {dimension_numbers = #tpu.dot_dimension_numbers<[1], [0], [0], [1], [0, 0, 1, 1], [], []>} : vector<64x128xbf16>, vector<128x128xbf16>, vector<64x128xf32> -> vector<64x128xf32>
    %64 = arith.addf %57, %63 : vector<64x128xf32>
    %c2_58 = arith.constant 2 : index
    %c1_59 = arith.constant 1 : index
    %c0_60 = arith.constant 0 : index
    %65 = vector.load %arg7[%c2_58, %c1_59, %c0_60] : memref<10x10x128xf32, #tpu.memory_space<vmem>>, vector<8x8x128xf32>
    %66 = vector.shape_cast %65 : vector<8x8x128xf32> to vector<64x128xf32>
    %67 = arith.truncf %66 : vector<64x128xf32> to vector<64x128xbf16>
    %c7 = arith.constant 7 : index
    %c0_61 = arith.constant 0 : index
    %c0_62 = arith.constant 0 : index
    %68 = vector.load %arg4[%c7, %c0_61, %c0_62] : memref<9x128x128xbf16, #tpu.memory_space<vmem>>, vector<1x128x128xbf16>
    %69 = vector.shape_cast %68 : vector<1x128x128xbf16> to vector<128x128xbf16>
    %cst_63 = arith.constant dense<0.000000e+00> : vector<64x128xf32>
    %70 = tpu.matmul %67, %69, %cst_63 {dimension_numbers = #tpu.dot_dimension_numbers<[1], [0], [0], [1], [0, 0, 1, 1], [], []>} : vector<64x128xbf16>, vector<128x128xbf16>, vector<64x128xf32> -> vector<64x128xf32>
    %71 = arith.addf %64, %70 : vector<64x128xf32>
    %c2_64 = arith.constant 2 : index
    %c2_65 = arith.constant 2 : index
    %c0_66 = arith.constant 0 : index
    %72 = vector.load %arg7[%c2_64, %c2_65, %c0_66] : memref<10x10x128xf32, #tpu.memory_space<vmem>>, vector<8x8x128xf32>
    %73 = vector.shape_cast %72 : vector<8x8x128xf32> to vector<64x128xf32>
    %74 = arith.truncf %73 : vector<64x128xf32> to vector<64x128xbf16>
    %c8 = arith.constant 8 : index
    %c0_67 = arith.constant 0 : index
    %c0_68 = arith.constant 0 : index
    %75 = vector.load %arg4[%c8, %c0_67, %c0_68] : memref<9x128x128xbf16, #tpu.memory_space<vmem>>, vector<1x128x128xbf16>
    %76 = vector.shape_cast %75 : vector<1x128x128xbf16> to vector<128x128xbf16>
    %cst_69 = arith.constant dense<0.000000e+00> : vector<64x128xf32>
    %77 = tpu.matmul %74, %76, %cst_69 {dimension_numbers = #tpu.dot_dimension_numbers<[1], [0], [0], [1], [0, 0, 1, 1], [], []>} : vector<64x128xbf16>, vector<128x128xbf16>, vector<64x128xf32> -> vector<64x128xf32>
    %78 = arith.addf %71, %77 : vector<64x128xf32>
    %79 = vector.shape_cast %78 : vector<64x128xf32> to vector<1x8x8x128xf32>
    %c0_70 = arith.constant 0 : index
    %c0_71 = arith.constant 0 : index
    %c0_72 = arith.constant 0 : index
    %c0_73 = arith.constant 0 : index
    %80 = vector.load %arg5[%c0_70, %c0_71, %c0_72, %c0_73] : memref<1x8x8x128xf32, #tpu.memory_space<vmem>>, vector<1x8x8x128xf32>
    tpu.vector_store %arg5[%c0_70, %c0_71, %c0_72, %c0_73], %79 {strides = array<i32>} : memref<1x8x8x128xf32, #tpu.memory_space<vmem>>, vector<1x8x8x128xf32>,
    %cst_74 = arith.constant dense<0.000000e+00> : vector<128xf32>
    %81 = vector.multi_reduction <add>, %78, %cst_74 [0] : vector<64x128xf32> to vector<128xf32>
    %82 = vector.shape_cast %81 : vector<128xf32> to vector<1x128xf32>
    %83 = arith.mulf %78, %78 : vector<64x128xf32>
    %cst_75 = arith.constant dense<0.000000e+00> : vector<128xf32>
    %84 = vector.multi_reduction <add>, %83, %cst_75 [0] : vector<64x128xf32> to vector<128xf32>
    %85 = vector.shape_cast %84 : vector<128xf32> to vector<1x128xf32>
    %86 = tpu.concatenate %82, %85 in 0 : vector<1x128xf32>, vector<1x128xf32> -> vector<2x128xf32>
    %87 = vector.shape_cast %86 : vector<2x128xf32> to vector<1x2x128xf32>
    %c0_76 = arith.constant 0 : index
    %c0_77 = arith.constant 0 : index
    %c0_78 = arith.constant 0 : index
    %88 = vector.load %arg6[%c0_76, %c0_77, %c0_78] : memref<1x2x128xf32, #tpu.memory_space<vmem>>, vector<1x2x128xf32>
    tpu.vector_store %arg6[%c0_76, %c0_77, %c0_78], %87 {strides = array<i32>} : memref<1x2x128xf32, #tpu.memory_space<vmem>>, vector<1x2x128xf32>,
    return
  }
  func.func @transform_0(%arg0: i32) -> (i32, i32, i32, i32) {
    %c0_i32 = arith.constant 0 : i32
    %c0_i32_0 = arith.constant 0 : i32
    %c0_i32_1 = arith.constant 0 : i32
    %c0_i32_2 = arith.constant 0 : i32
    return %arg0, %c0_i32, %c0_i32_0, %c0_i32_1 : i32, i32, i32, i32
  }
  func.func @transform_1(%arg0: i32) -> (i32, i32) {
    %c0_i32 = arith.constant 0 : i32
    %c0_i32_0 = arith.constant 0 : i32
    %c0_i32_1 = arith.constant 0 : i32
    return %c0_i32, %c0_i32_0 : i32, i32
  }
  func.func @transform_2(%arg0: i32) -> (i32, i32) {
    %c0_i32 = arith.constant 0 : i32
    %c0_i32_0 = arith.constant 0 : i32
    %c0_i32_1 = arith.constant 0 : i32
    return %c0_i32, %c0_i32_0 : i32, i32
  }
  func.func @transform_3(%arg0: i32) -> (i32, i32, i32) {
    %c0_i32 = arith.constant 0 : i32
    %c0_i32_0 = arith.constant 0 : i32
    %c0_i32_1 = arith.constant 0 : i32
    %c0_i32_2 = arith.constant 0 : i32
    return %c0_i32, %c0_i32_0, %c0_i32_1 : i32, i32, i32
  }
  func.func @transform_4(%arg0: i32) -> (i32, i32, i32, i32) {
    %c0_i32 = arith.constant 0 : i32
    %c0_i32_0 = arith.constant 0 : i32
    %c0_i32_1 = arith.constant 0 : i32
    %c0_i32_2 = arith.constant 0 : i32
    return %arg0, %c0_i32, %c0_i32_0, %c0_i32_1 : i32, i32, i32, i32
  }
  func.func @transform_5(%arg0: i32) -> (i32, i32, i32) {
    %c0_i32 = arith.constant 0 : i32
    %c0_i32_0 = arith.constant 0 : i32
    %c0_i32_1 = arith.constant 0 : i32
    return %arg0, %c0_i32, %c0_i32_0 : i32, i32, i32
  }
}

module attributes {stable_mosaic.version = 11 : i64} {
  func.func @_bn_add_relu_kernel(%arg0: i32, %arg1: memref<1x8x8x128xf32, #tpu.memory_space<vmem>>, %arg2: memref<1x8x8x128xf32, #tpu.memory_space<vmem>>, %arg3: memref<1x128xf32, #tpu.memory_space<vmem>>, %arg4: memref<1x128xf32, #tpu.memory_space<vmem>>, %arg5: memref<1x128xf32, #tpu.memory_space<vmem>>, %arg6: memref<1x128xf32, #tpu.memory_space<vmem>>, %arg7: memref<1x8x8x128xf32, #tpu.memory_space<vmem>>) attributes {dimension_semantics = [#tpu.dimension_semantics<parallel>], iteration_bounds = array<i64: 2>, scalar_prefetch = 0 : i64, scratch_operands = 0 : i64, tpu.core_type = #tpu.core_type<tc>, window_params = [{transform_indices = @transform_0, window_bounds = array<i64: 1, 8, 8, 128>}, {transform_indices = @transform_1, window_bounds = array<i64: 1, 8, 8, 128>}, {pipeline_mode = #tpu.pipeline_mode<synchronous>, transform_indices = @transform_2, window_bounds = array<i64: 1, 128>}, {pipeline_mode = #tpu.pipeline_mode<synchronous>, transform_indices = @transform_3, window_bounds = array<i64: 1, 128>}, {pipeline_mode = #tpu.pipeline_mode<synchronous>, transform_indices = @transform_4, window_bounds = array<i64: 1, 128>}, {pipeline_mode = #tpu.pipeline_mode<synchronous>, transform_indices = @transform_5, window_bounds = array<i64: 1, 128>}, {transform_indices = @transform_6, window_bounds = array<i64: 1, 8, 8, 128>}]} {
    %c0 = arith.constant 0 : index
    %c0_0 = arith.constant 0 : index
    %0 = vector.load %arg3[%c0, %c0_0] : memref<1x128xf32, #tpu.memory_space<vmem>>, vector<1x128xf32>
    %1 = vector.shape_cast %0 : vector<1x128xf32> to vector<1x1x1x128xf32>
    %c0_1 = arith.constant 0 : index
    %c0_2 = arith.constant 0 : index
    %2 = vector.load %arg4[%c0_1, %c0_2] : memref<1x128xf32, #tpu.memory_space<vmem>>, vector<1x128xf32>
    %3 = vector.shape_cast %2 : vector<1x128xf32> to vector<1x1x1x128xf32>
    %c0_3 = arith.constant 0 : index
    %c0_4 = arith.constant 0 : index
    %4 = vector.load %arg5[%c0_3, %c0_4] : memref<1x128xf32, #tpu.memory_space<vmem>>, vector<1x128xf32>
    %5 = vector.shape_cast %4 : vector<1x128xf32> to vector<1x1x1x128xf32>
    %c0_5 = arith.constant 0 : index
    %c0_6 = arith.constant 0 : index
    %6 = vector.load %arg6[%c0_5, %c0_6] : memref<1x128xf32, #tpu.memory_space<vmem>>, vector<1x128xf32>
    %7 = vector.shape_cast %6 : vector<1x128xf32> to vector<1x1x1x128xf32>
    %c0_7 = arith.constant 0 : index
    %c0_8 = arith.constant 0 : index
    %c0_9 = arith.constant 0 : index
    %c0_10 = arith.constant 0 : index
    %8 = vector.load %arg1[%c0_7, %c0_8, %c0_9, %c0_10] : memref<1x8x8x128xf32, #tpu.memory_space<vmem>>, vector<1x8x8x128xf32>
    %9 = vector.broadcast %1 : vector<1x1x1x128xf32> to vector<1x8x8x128xf32>
    %10 = arith.mulf %8, %9 : vector<1x8x8x128xf32>
    %11 = vector.broadcast %3 : vector<1x1x1x128xf32> to vector<1x8x8x128xf32>
    %12 = arith.addf %10, %11 : vector<1x8x8x128xf32>
    %c0_11 = arith.constant 0 : index
    %c0_12 = arith.constant 0 : index
    %c0_13 = arith.constant 0 : index
    %c0_14 = arith.constant 0 : index
    %13 = vector.load %arg2[%c0_11, %c0_12, %c0_13, %c0_14] : memref<1x8x8x128xf32, #tpu.memory_space<vmem>>, vector<1x8x8x128xf32>
    %14 = vector.broadcast %5 : vector<1x1x1x128xf32> to vector<1x8x8x128xf32>
    %15 = arith.mulf %13, %14 : vector<1x8x8x128xf32>
    %16 = arith.addf %12, %15 : vector<1x8x8x128xf32>
    %17 = vector.broadcast %7 : vector<1x1x1x128xf32> to vector<1x8x8x128xf32>
    %18 = arith.addf %16, %17 : vector<1x8x8x128xf32>
    %cst = arith.constant 0.000000e+00 : f32
    %19 = vector.broadcast %cst : f32 to vector<1x8x8x128xf32>
    %20 = arith.maximumf %18, %19 : vector<1x8x8x128xf32>
    %c0_15 = arith.constant 0 : index
    %c0_16 = arith.constant 0 : index
    %c0_17 = arith.constant 0 : index
    %c0_18 = arith.constant 0 : index
    %21 = vector.load %arg7[%c0_15, %c0_16, %c0_17, %c0_18] : memref<1x8x8x128xf32, #tpu.memory_space<vmem>>, vector<1x8x8x128xf32>
    tpu.vector_store %arg7[%c0_15, %c0_16, %c0_17, %c0_18], %20 {strides = array<i32>} : memref<1x8x8x128xf32, #tpu.memory_space<vmem>>, vector<1x8x8x128xf32>,
    return
  }
  func.func @transform_0(%arg0: i32) -> (i32, i32, i32, i32) {
    %c0_i32 = arith.constant 0 : i32
    %c0_i32_0 = arith.constant 0 : i32
    %c0_i32_1 = arith.constant 0 : i32
    %c0_i32_2 = arith.constant 0 : i32
    return %arg0, %c0_i32, %c0_i32_0, %c0_i32_1 : i32, i32, i32, i32
  }
  func.func @transform_1(%arg0: i32) -> (i32, i32, i32, i32) {
    %c0_i32 = arith.constant 0 : i32
    %c0_i32_0 = arith.constant 0 : i32
    %c0_i32_1 = arith.constant 0 : i32
    %c0_i32_2 = arith.constant 0 : i32
    return %arg0, %c0_i32, %c0_i32_0, %c0_i32_1 : i32, i32, i32, i32
  }
  func.func @transform_2(%arg0: i32) -> (i32, i32) {
    %c0_i32 = arith.constant 0 : i32
    %c0_i32_0 = arith.constant 0 : i32
    %c0_i32_1 = arith.constant 0 : i32
    return %c0_i32, %c0_i32_0 : i32, i32
  }
  func.func @transform_3(%arg0: i32) -> (i32, i32) {
    %c0_i32 = arith.constant 0 : i32
    %c0_i32_0 = arith.constant 0 : i32
    %c0_i32_1 = arith.constant 0 : i32
    return %c0_i32, %c0_i32_0 : i32, i32
  }
  func.func @transform_4(%arg0: i32) -> (i32, i32) {
    %c0_i32 = arith.constant 0 : i32
    %c0_i32_0 = arith.constant 0 : i32
    %c0_i32_1 = arith.constant 0 : i32
    return %c0_i32, %c0_i32_0 : i32, i32
  }
  func.func @transform_5(%arg0: i32) -> (i32, i32) {
    %c0_i32 = arith.constant 0 : i32
    %c0_i32_0 = arith.constant 0 : i32
    %c0_i32_1 = arith.constant 0 : i32
    return %c0_i32, %c0_i32_0 : i32, i32
  }
  func.func @transform_6(%arg0: i32) -> (i32, i32, i32, i32) {
    %c0_i32 = arith.constant 0 : i32
    %c0_i32_0 = arith.constant 0 : i32
    %c0_i32_1 = arith.constant 0 : i32
    %c0_i32_2 = arith.constant 0 : i32
    return %arg0, %c0_i32, %c0_i32_0, %c0_i32_1 : i32, i32, i32, i32
  }
}

</mosaic_0001>

<bundles_post_ra>
// kernel: _lambda_.5
= control target key start
LH: loop header
LB: loop body
LE: loop exit
PB: predicated region body
PF: predicated region fallthrough
CT: control target
= control target key end

     0   :  { %s510_s21 = smov 0   ;;  %s587_s0 = inlined_call_operand.vmem [shape: f32[2,8,8,128], index: 0, kind: input, shape index: {}]   ;;  %s588_s1 = inlined_call_operand.vmem [shape: f32[2,8,8,128], index: 1, kind: input, shape index: {}]   ;;  %s589_s2 = inlined_call_operand.vmem [shape: f32[1,128], index: 2, kind: input, shape index: {}]   ;;  %s590_s3 = inlined_call_operand.vmem [shape: f32[1,128], index: 3, kind: input, shape index: {}]   ;;  %s591_s4 = inlined_call_operand.vmem [shape: f32[1,128], index: 4, kind: input, shape index: {}]   ;;  %s592_s5 = inlined_call_operand.vmem [shape: f32[1,128], index: 5, kind: input, shape index: {}]   ;;  %s593_s6 = inlined_call_operand.vmem [shape: f32[2,8,8,128], index: 6, kind: output, shape index: {}]  }
   0x1 LB: > { %s439_s22 = sadd.s32 4294967295, %s473_s21   ;;  %p443_p0 = scmp.ge.s32.totalorder %s473_s21, 1  ;;  %s473_s21 = sphi %s510_s21, %s16_s21  }
   0x2   : > { %p222_p1 = scmp.lt.s32.totalorder %s473_s21, 3 }
   0x4   : > { %p223_p2 = pnand %p443_p0, %p222_p1 }
   0x5   : > { %p257_p3 = scmp.lt.s32.totalorder (!%p223_p2), %s439_s22, 1  ;;  %v450_v0 = vld [vmem:[%s589_s2] ss:$0 sm:$0xff] (!%p223_p2) }
   0x6   : > { %226 = sbr.rel (%p223_p2) target bundleno = 36 (0x24), region = 44  ;;  %v526_v1 = vld [vmem:[%s591_s4] ss:$0 sm:$0xff] (!%p223_p2) }
   0x7   : > { %v451_v2 = vld [vmem:[%s590_s3] ss:$0 sm:$0xff] (!%p223_p2) }
   0x8   : > { %v453_v25 = vld [vmem:[%s592_s5] ss:$0 sm:$0xff] (!%p223_p2) }
   0xd   : > { %s595_s22 = smov (!%p257_p3, %s439_s22), 1 }
   0xe   : > { %s518_s23 = sshll.u32 %s595_s22, 6 }
   0xf   : > { %s532_s30 = scalar_lea.vmem %s587_s0, %s518_s23  ;;  %s538_s9 = scalar_lea.vmem %s588_s1, %s518_s23 }
  0x10   : > { %v276_v3 = vld [vmem:[%s532_s30] sm:$0xff]  ;;  %v277_v5 = vld [vmem:[%s532_s30 + $0x8] sm:$0xff]  ;;  %v278_v10 = vld [vmem:[%s532_s30 + $0x10] sm:$0xff]  ;;  %s572_s16 = scalar_lea.vmem %s593_s6, %s518_s23 }
  0x11   : > { %v312_v4 = vld [vmem:[%s538_s9] sm:$0xff]  ;;  %v290_v6 = vmul.f32 %v450_v0, %v276_v3  ;;  %v291_v8 = vmul.f32 %v450_v0, %v277_v5  ;;  %v313_v9 = vld [vmem:[%s538_s9 + $0x8] sm:$0xff]  ;;  %v314_v11 = vld [vmem:[%s538_s9 + $0x10] sm:$0xff]  ;;  %v292_v13 = vmul.f32 %v450_v0, %v278_v10 }
  0x12   : > { %v326_v7 = vmul.f32 %v526_v1, %v312_v4  ;;  %v327_v12 = vmul.f32 %v526_v1, %v313_v9  ;;  %v328_v14 = vmul.f32 %v526_v1, %v314_v11  ;;  %v279_v15 = vld [vmem:[%s532_s30 + $0x18] sm:$0xff]  ;;  %v280_v17 = vld [vmem:[%s532_s30 + $0x20] sm:$0xff]  ;;  %v281_v23 = vld [vmem:[%s532_s30 + $0x28] sm:$0xff] }
  0x13   : > { %v315_v16 = vld [vmem:[%s538_s9 + $0x18] sm:$0xff]  ;;  %v304_v18 = vadd.f32 %v451_v2, %v290_v6  ;;  %v305_v19 = vadd.f32 %v451_v2, %v291_v8  ;;  %v293_v20 = vmul.f32 %v450_v0, %v279_v15  ;;  %v316_v22 = vld [vmem:[%s538_s9 + $0x20] sm:$0xff]  ;;  %v317_v24 = vld [vmem:[%s538_s9 + $0x28] sm:$0xff]  ;;  %v306_v26 = vadd.f32 %v451_v2, %v292_v13 }
  0x14   : > { %v329_v21 = vmul.f32 %v526_v1, %v315_v16  ;;  %v294_v27 = vmul.f32 %v450_v0, %v280_v17  ;;  %v330_v28 = vmul.f32 %v526_v1, %v316_v22  ;;  %v295_v29 = vmul.f32 %v450_v0, %v281_v23  ;;  %v282_v30 = vld [vmem:[%s532_s30 + $0x30] sm:$0xff]  ;;  %v283_v40 = vld [vmem:[%s532_s30 + $0x38] sm:$0xff] }
  0x15   : > { %v318_v31 = vld [vmem:[%s538_s9 + $0x30] sm:$0xff]  ;;  %v334_v32 = vadd.f32 %v326_v7, %v304_v18  ;;  %v335_v33 = vadd.f32 %v327_v12, %v305_v19  ;;  %v307_v34 = vadd.f32 %v451_v2, %v293_v20  ;;  %v331_v35 = vmul.f32 %v526_v1, %v317_v24  ;;  %v319_v49 = vld [vmem:[%s538_s9 + $0x38] sm:$0xff] }
  0x16   : > { %v336_v36 = vadd.f32 %v328_v14, %v306_v26  ;;  %v308_v37 = vadd.f32 %v451_v2, %v294_v27  ;;  %v309_v38 = vadd.f32 %v451_v2, %v295_v29  ;;  %v296_v39 = vmul.f32 %v450_v0, %v282_v30 }
  0x17   : > { %v348_v41 = vadd.f32 %v453_v25, %v334_v32  ;;  %v349_v42 = vadd.f32 %v453_v25, %v335_v33  ;;  %v337_v43 = vadd.f32 %v329_v21, %v307_v34  ;;  %v332_v44 = vmul.f32 %v526_v1, %v318_v31 }
  0x18   : > { %v350_v45 = vadd.f32 %v453_v25, %v336_v36  ;;  %v338_v46 = vadd.f32 %v330_v28, %v308_v37  ;;  %v339_v47 = vadd.f32 %v331_v35, %v309_v38  ;;  %v310_v48 = vadd.f32 %v451_v2, %v296_v39 }
  0x19   : > { %v356_v50 = vmax.f32 %v348_v41, 0.0  ;;  %v357_v51 = vmax.f32 %v349_v42, 0.0  ;;  %v351_v52 = vadd.f32 %v453_v25, %v337_v43  ;;  %v297_v53 = vmul.f32 %v450_v0, %v283_v40 }
  0x1a   : > { %v358_v54 = vmax.f32 %v350_v45, 0.0  ;;  %v352_v55 = vadd.f32 %v453_v25, %v338_v46  ;;  %v353_v56 = vadd.f32 %v453_v25, %v339_v47  ;;  %v340_v57 = vadd.f32 %v332_v44, %v310_v48 }
  0x1b   : > { %364 = vst [vmem:[%s572_s16] sm:$0xff] %v356_v50  ;;  %365 = vst [vmem:[%s572_s16 + $0x8] sm:$0xff] %v357_v51  ;;  %v359_v58 = vmax.f32 %v351_v52, 0.0  ;;  %v311_v59 = vadd.f32 %v451_v2, %v297_v53  ;;  %v333_v60 = vmul.f32 %v526_v1, %v319_v49 }
  0x1c   : > { %366 = vst [vmem:[%s572_s16 + $0x10] sm:$0xff] %v358_v54  ;;  %v360_v61 = vmax.f32 %v352_v55, 0.0  ;;  %v361_v62 = vmax.f32 %v353_v56, 0.0  ;;  %v354_v63 = vadd.f32 %v453_v25, %v340_v57 }
  0x1d   : > { %367 = vst [vmem:[%s572_s16 + $0x18] sm:$0xff] %v359_v58  ;;  %v341_v0 = vadd.f32 %v333_v60, %v311_v59 }
  0x1e   : > { %368 = vst [vmem:[%s572_s16 + $0x20] sm:$0xff] %v360_v61  ;;  %369 = vst [vmem:[%s572_s16 + $0x28] sm:$0xff] %v361_v62  ;;  %v362_v3 = vmax.f32 %v354_v63, 0.0 }
  0x1f   : > { %v355_v4 = vadd.f32 %v453_v25, %v341_v0 }
  0x20   : > { %370 = vst [vmem:[%s572_s16 + $0x30] sm:$0xff] %v362_v3 }
  0x21   : > { %v363_v5 = vmax.f32 %v355_v4, 0.0 }
  0x23   : > { %371 = vst [vmem:[%s572_s16 + $0x38] sm:$0xff] %v363_v5 }
  0x24 PF: > { %s16_s21 = sadd.s32 1, %s473_s21  }
  0x25   : > { %p13_p4 = scmp.ge.s32.totalorder %s16_s21, 4  }
  0x27   :  { %15 = sbr.rel (!%p13_p4) target bundleno = 1 (0x1), region = 77 }

// kernel: _lambda_.3
= control target key start
LH: loop header
LB: loop body
LE: loop exit
PB: predicated region body
PF: predicated region fallthrough
CT: control target
= control target key end

     0   :  { %s2238_s21 = smov 0   ;;  %s2665_s0 = inlined_call_operand.vmem [shape: bf16[2,4,9,9,4], index: 0, kind: input, shape index: {}]   ;;  %s2666_s1 = inlined_call_operand.vmem [shape: bf16[9,4,128], index: 1, kind: input, shape index: {}]   ;;  %s2667_s2 = inlined_call_operand.vmem [shape: bf16[4,128], index: 2, kind: input, shape index: {}]   ;;  %s2668_s3 = inlined_call_operand.vmem [shape: f32[2,8,8,128], index: 3, kind: output, shape index: {0}]   ;;  %s2669_s4 = inlined_call_operand.vmem [shape: f32[2,2,128], index: 4, kind: output, shape index: {1}]   ;;  %s2670_s5 = inlined_call_operand.vmem [shape: f32[2,8,8,128], index: 5, kind: output, shape index: {2}]   ;;  %s2671_s6 = inlined_call_operand.vmem [shape: f32[2,2,128], index: 6, kind: output, shape index: {3}]  }
   0x1 LB: > { %s1805_s22 = sadd.s32 4294967295, %s2201_s21   ;;  %p1809_p0 = scmp.ge.s32.totalorder %s2201_s21, 1  ;;  %s2201_s21 = sphi %s2238_s21, %s17_s21  }
   0x2   : > { %p219_p1 = scmp.lt.s32.totalorder %s2201_s21, 3 }
   0x4   : > { %p220_p2 = pnand %p1809_p0, %p219_p1 }
   0x5   : > { %vm376_vm0 = vcmask (!%p220_p2), 1041408   ;;  %v1885_v0 = vld [vmem:[%s2666_s1 + $0x8] sm:$0x3] (!%p220_p2)  ;;  %v1850_v1 = vld [vmem:[%s2666_s1 + $0x2] sm:$0x3] (!%p220_p2)  ;;  %p262_p3 = scmp.lt.s32.totalorder (!%p220_p2), %s1805_s22, 1 }
   0x6   : > { %223 = sbr.rel (%p220_p2) target bundleno = 341 (0x155), region = 32  ;;  %2156 = vmatprep.subr.msk.bf16.mxu0 (!%p220_p2), %vm376_vm0, %v1885_v0  ;;  %2152 = vmatprep.subr.msk.bf16.mxu1 (!%p220_p2), %vm376_vm0, %v1850_v1  ;;  %v907_v2 = vsel (!%p220_p2), %vm376_vm0, %v1885_v0, 0  ;;  %v378_v3 = vsel (!%p220_p2), %vm376_vm0, %v1850_v1, 0  ;;  %v1894_v4 = vld [vmem:[%s2666_s1 + $0xa] sm:$0x3] (!%p220_p2)  ;;  %vm363_vm1 = vcmask (!%p220_p2), 31744  }
   0x7   : > { %2029 = vmatpush3.bf16.msra.mxu0 (!%p220_p2), %v907_v2  ;;  %1989 = vmatpush3.bf16.msra.mxu1 (!%p220_p2), %v378_v3  ;;  %v340_v5 = vld [vmem:[%s2666_s1] sm:$0x3] (!%p220_p2)  ;;  %v1121_v6 = vsel (!%p220_p2), %vm376_vm0, %v1894_v4, 0  ;;  %v1903_v14 = vld [vmem:[%s2666_s1 + $0xc] sm:$0x3] (!%p220_p2)  ;;  %vm1539_vm5 = vcmask (!%p220_p2), 1040384  }
   0x8   : > { %2157 = vmatprep.subr.msk.bf16.mxu0 (!%p220_p2), %vm376_vm0, %v1894_v4  ;;  %2153 = vmatprep.subr.msk.bf16.mxu1 (!%p220_p2), %vm376_vm0, %v340_v5  ;;  %v478_v7 = vsel (!%p220_p2), %vm376_vm0, %v340_v5, 0  ;;  %v1867_v15 = vld [vmem:[%s2666_s1 + $0x4] sm:$0x3] (!%p220_p2)  ;;  %vm545_vm2 = vsmask.f32 (!%p220_p2), 3328  ;;  %v2330_v26 = vsel (!%p220_p2), %vm376_vm0, %v1903_v14, 0 }
   0x9   : > { %vm546_vm3 = vsmask.f32 (!%p220_p2), 7440  ;;  %v2309_v20 = vld [vmem:[%s2666_s1 + $0x6] sm:$0x3] (!%p220_p2)  ;;  %v2333_v27 = vsel (!%p220_p2), %vm376_vm0, %v1867_v15, 0 }
   0xa   : > { %v2358_v38 = vsel (!%p220_p2), %vm376_vm0, %v2309_v20, 0  ;;  %vm2394_vm4 = vmor (!%p220_p2), %vm545_vm2, %vm546_vm3 }
   0xd   : > { %s2679_s22 = smov (!%p262_p3, %s1805_s22), 1 }
   0xe   : > { %s2162_s7 = smul.u32 288, %s2679_s22  ;;  %s1936_s25 = sshll.u32 %s2679_s22, 6 }
   0xf   : > { %s2631_s28 = scalar_lea.vmem %s2670_s5, %s1936_s25  ;;  %s1813_s8 = sshll.u32 %s2679_s22, 1 }
  0x10   : > { %s2270_s10 = scalar_lea.vmem %s2665_s0, %s2162_s7  ;;  %s2636_s7 = scalar_lea.vmem %s2668_s3, %s1936_s25 }
  0x11   : > { %v1817_v8 = vld [vmem:[%s2270_s10 + $0x48] sm:$0xf]  ;;  %v2276_v9 = vld [vmem:[%s2270_s10 + $0x50] sm:$0xf]  ;;  %v2279_v10 = vld [vmem:[%s2270_s10 + $0x58] sm:$0xf]  ;;  %s284_s11 = scalar_lea.vmem %s2671_s6, %s1813_s8  ;;  %s275_s14 = scalar_lea.vmem %s2669_s4, %s1813_s8 }
  0x12   : > { %v2282_v11 = vld [vmem:[%s2270_s10 + $0x60] sm:$0xf]  ;;  %v2285_v12 = vld [vmem:[%s2270_s10 + $0x68] sm:$0xf]  ;;  %v1851_v13 = vcombine.low %v1817_v8, %v2276_v9  ;;  %v2304_v19 = vld [vmem:[%s2270_s10 + $0x70] sm:$0xf] }
  0x13   : > { %v1852_v16 = vcombine.low %v2279_v10, %v2282_v11  ;;  %v2297_v17 = vld [vmem:[%s2270_s10 + $0xd8] ss:$8 sps:$4 sm:$0xff]   ;;  %v2301_v18 = vld [vmem:[%s2270_s10 + $0xe8] ss:$8 sps:$4 sm:$0xff]   ;;  %v1853_v21 = vcombine.low %v2285_v12, %v2304_v19  ;;  %v1827_v36 = vld [vmem:[%s2270_s10 + $0x94] sm:$0x1] }
  0x14   : > { %1990 = vmatprep.mubr.msk.bf16.mxu1 %vm363_vm1, %v1851_v13  ;;  %2030 = vmatprep.mubr.msk.bf16.mxu0 %vm363_vm1, %v2297_v17  ;;  %v2317_v22 = vld [vmem:[%s2270_s10 + $0xf8] ss:$8 sps:$4 sm:$0xff]   ;;  %v2338_v28 = vld [vmem:[%s2270_s10 + $0x108] ss:$8 sps:$4 sm:$0xff]   ;;  %v1829_v41 = vld [vmem:[%s2270_s10 + $0x9c] sm:$0x1] }
  0x15   : > { %1991 = vmatmul.mubr.msk.bf16.vlgmr.msra.gmra.mrb[0].mxu1 %vm363_vm1, %v1852_v16  ;;  %2031 = vmatmul.mubr.msk.bf16.vlgmr.msra.gmra.mrb[0].mxu0 %vm363_vm1, %v2301_v18  ;;  %v2322_v23 = vld [vmem:[%s2270_s10 + $0x78] sm:$0xf]  ;;  %v2325_v24 = vld [vmem:[%s2270_s10 + $0x80] sm:$0xf]  ;;  %v2341_v29 = vld [vmem:[%s2270_s10 + $0x8] sm:$0xf] }
  0x16   : > { %1999 = vmatpush3.bf16.msra.mxu1 %v478_v7  ;;  %2039 = vmatpush3.bf16.msra.mxu0 %v1121_v6  ;;  %v286_v25 = vld [vmem:[%s2270_s10] sm:$0xf]  ;;  %v2344_v32 = vld [vmem:[%s2270_s10 + $0x90] sm:$0xf]  ;;  %v1854_v33 = vcombine.low %v2322_v23, %v2325_v24  ;;  %v563_v35 = vshrl.u32 %v2341_v29, 16  ;;  %v566_v40 = vshll.u32 %v2341_v29, 16  ;;  %v1915_v1 = vcombine.low %v2304_v19, %v2322_v23 }
  0x17   : > { %1994 = vmatprep.mubr.msk.bf16.mxu1 %vm363_vm1, %v1853_v21  ;;  %2034 = vmatprep.mubr.msk.bf16.mxu0 %vm363_vm1, %v2317_v22  ;;  %v549_v30 = vshrl.u32 %v286_v25, 16  ;;  %v552_v31 = vshll.u32 %v286_v25, 16  ;;  %v1859_v34 = vcombine.low %v286_v25, %v2341_v29  ;;  %v2353_v37 = vld [vmem:[%s2270_s10 + $0x98] sm:$0xf]  ;;  %v983_v42 = vshrl.u32 %v2344_v32, 16 }
  0x18   : > { %2158 = vmatprep.subr.msk.bf16.mxu0 %vm376_vm0, %v1903_v14  ;;  %2154 = vmatprep.subr.msk.bf16.mxu1 %vm376_vm0, %v1867_v15  ;;  %v986_v43 = vshll.u32 %v2344_v32, 16  ;;  %v992_v44 = vshll.u32 %v1827_v36, 16  ;;  %v997_v45 = vshrl.u32 %v2353_v37, 16  ;;  %v1000_v46 = vshll.u32 %v2353_v37, 16  ;;  %v2369_v48 = vld [vmem:[%s2270_s10 + $0x10] sm:$0xf] }
  0x19   : > { %v2360_v39 = vrot.slane %v549_v30, 4  ;;  %v1006_v47 = vshll.u32 %v1829_v41, 16  ;;  %v2371_v49 = vrot.slane %v552_v31, 5  ;;  %v985_v50 = vrot.slane %v983_v42, 4  ;;  %v2374_v52 = vld [vmem:[%s2270_s10 + $0x18] sm:$0xf] }
  0x1a   : > { %v988_v51 = vrot.slane %v986_v43, 5  ;;  %v577_v53 = vshrl.u32 %v2369_v48, 16  ;;  %v994_v54 = vrot.slane %v992_v44, 5  ;;  %v999_v55 = vrot.slane %v997_v45, 4  ;;  %v2380_v58 = vld [vmem:[%s2270_s10 + $0xa0] sm:$0xf] }
  0x1b   : > { %v1002_v56 = vrot.slane %v1000_v46, 5  ;;  %v580_v57 = vshll.u32 %v2369_v48, 16  ;;  %v1008_v60 = vrot.slane %v1006_v47, 5  ;;  %v1860_v61 = vcombine.low %v2369_v48, %v2374_v52  ;;  %v1831_v63 = vld [vmem:[%s2270_s10 + $0xa4] sm:$0x1] }
  0x1c   : > { %v989_v59 = vor.u32 %v988_v51, %v985_v50  ;;  %v591_v62 = vshrl.u32 %v2374_v52, 16  ;;  %v2390_v0 = vld [vmem:[%s2270_s10 + $0xa8] sm:$0xf]  ;;  %v1833_v3 = vld [vmem:[%s2270_s10 + $0xac] sm:$0x1]  ;;  %v1011_v4 = vshrl.u32 %v2380_v58, 16 }
  0x1d   : > { %1995 = vmatmul.mubr.msk.bf16.gmra.mrb[4].mxu1 %vm363_vm1, %v1854_v33  ;;  %2035 = vmatmul.mubr.msk.bf16.gmra.mrb[4].mxu0 %vm363_vm1, %v2338_v28  ;;  %v1003_v2 = vor.u32 %v1002_v56, %v999_v55  ;;  %v1014_v5 = vshll.u32 %v2380_v58, 16  ;;  %v1020_v6 = vshll.u32 %v1831_v63, 16  ;;  %v1025_v8 = vshrl.u32 %v2390_v0, 16  ;;  %v2404_v15 = vld [vmem:[%s2270_s10 + $0x20] sm:$0xf] }
  0x1e   : > { %2000 = vmatprep.mubr.msk.bf16.mxu1 %vm363_vm1, %v1859_v34  ;;  %v990_v7 = vrot.slane %v989_v59, 4  ;;  %v1028_v13 = vshll.u32 %v2390_v0, 16  ;;  %v1034_v14 = vshll.u32 %v1833_v3, 16  ;;  %v594_v21 = vshll.u32 %v2374_v52, 16  ;;  %v2408_v31 = vld [vmem:[%s2270_s10 + $0x28] sm:$0xf] }
  0x1f   : > { %v1004_v16 = vrot.slane %v1003_v2, 4  ;;  %v1013_v25 = vrot.slane %v1011_v4, 4  ;;  %v1016_v30 = vrot.slane %v1014_v5, 5  ;;  %v1022_v34 = vrot.slane %v1020_v6, 5  ;;  %v2413_v42 = vld [vmem:[%s2270_s10 + $0xb0] sm:$0xf] }
  0x20   : > { %v995_v33 = vsel %vm2394_vm4, %v990_v7, %v994_v54  ;;  %v1027_v36 = vrot.slane %v1025_v8, 4  ;;  %v1030_v41 = vrot.slane %v1028_v13, 5  ;;  %v1036_v45 = vrot.slane %v1034_v14, 5  ;;  %v1835_v47 = vld [vmem:[%s2270_s10 + $0xb4] sm:$0x1] }
  0x21   : > { %v1009_v43 = vsel %vm2394_vm4, %v1004_v16, %v1008_v60  ;;  %v1017_v44 = vor.u32 %v1016_v30, %v1013_v25  ;;  %v1861_v46 = vcombine.low %v2404_v15, %v2408_v31  ;;  %v2421_v50 = vld [vmem:[%s2270_s10 + $0xb8] sm:$0xf]  ;;  %v605_v54 = vshrl.u32 %v2404_v15, 16  ;;  %v1837_v59 = vld [vmem:[%s2270_s10 + $0xbc] sm:$0x1] }
  0x22   : > { %v1895_v51 = vcombine.low %v995_v33, %v1009_v43  ;;  %v1031_v55 = vor.u32 %v1030_v41, %v1027_v36  ;;  %v608_v56 = vshll.u32 %v2404_v15, 16  ;;  %v619_v63 = vshrl.u32 %v2408_v31, 16  ;;  %v2431_v4 = vld [vmem:[%s2270_s10 + $0x30] sm:$0xf]  ;;  %v2438_v8 = vld [vmem:[%s2270_s10 + $0x38] sm:$0xf] }
  0x23   : > { %v1018_v60 = vrot.slane %v1017_v44, 4  ;;  %v622_v2 = vshll.u32 %v2408_v31, 16  ;;  %v1039_v3 = vshrl.u32 %v2413_v42, 16  ;;  %v1042_v6 = vshll.u32 %v2413_v42, 16  ;;  %v2451_v36 = vld [vmem:[%s2270_s10 + $0xc0] sm:$0xf] }
  0x24   : > { %2040 = vmatprep.mubr.msk.bf16.mxu0 %vm363_vm1, %v1895_v51  ;;  %v1032_v5 = vrot.slane %v1031_v55, 4  ;;  %v1048_v7 = vshll.u32 %v1835_v47, 16  ;;  %v1056_v16 = vshll.u32 %v2421_v50, 16  ;;  %v1062_v25 = vshll.u32 %v1837_v59, 16  ;;  %v2456_v41 = vld [vmem:[%s2666_s1 + $0xe] sm:$0x3] }
  0x25   : > { %2001 = vmatmul.mubr.msk.bf16.vlgmr.msra.gmra.mrb[0].mxu1 %vm363_vm1, %v1860_v61  ;;  %v1053_v61 = vshrl.u32 %v2421_v50, 16  ;;  %v1023_v13 = vsel %vm2394_vm4, %v1018_v60, %v1022_v34  ;;  %v1041_v14 = vrot.slane %v1039_v3, 4  ;;  %v1044_v33 = vrot.slane %v1042_v6, 5  ;;  %v2462_v47 = vld [vmem:[%s2270_s10 + $0xc8] sm:$0xf] }
  0x26   : > { %2009 = vmatpush3.bf16.msra.mxu1 %v2333_v27  ;;  %2004 = vmatprep.mubr.msk.bf16.mxu1 %vm363_vm1, %v1861_v46  ;;  %v1037_v27 = vsel %vm2394_vm4, %v1032_v5, %v1036_v45  ;;  %v1050_v44 = vrot.slane %v1048_v7, 5  ;;  %v1058_v46 = vrot.slane %v1056_v16, 5  ;;  %v1839_v45 = vld [vmem:[%s2270_s10 + $0xc4] sm:$0x1]  ;;  %v1064_v55 = vrot.slane %v1062_v25, 5 }
  0x27   : > { %2155 = vmatprep.subr.msk.bf16.mxu1 %vm376_vm0, %v2309_v20  ;;  %v1055_v34 = vrot.slane %v1053_v61, 4  ;;  %v1896_v43 = vcombine.low %v1023_v13, %v1037_v27  ;;  %v1862_v20 = vcombine.low %v2431_v4, %v2438_v8  ;;  %v1045_v51 = vor.u32 %v1044_v33, %v1041_v14  ;;  %v1841_v3 = vld [vmem:[%s2270_s10 + $0xcc] sm:$0x1] }
  0x28   : > { %v1067_v7 = vshrl.u32 %v2451_v36, 16  ;;  %v1070_v61 = vshll.u32 %v2451_v36, 16  ;;  %v1076_v14 = vshll.u32 %v1839_v45, 16  ;;  %v1081_v16 = vshrl.u32 %v2462_v47, 16  ;;  %v289_v6 = vld [vmem:[%s2270_s10 + $0xc] sm:$0x1] }
  0x29   : > { %2041 = vmatmul.mubr.msk.bf16.vlgmr.msra.gmra.mrb[0].mxu0 %vm363_vm1, %v1896_v43  ;;  %v1059_v5 = vor.u32 %v1058_v46, %v1055_v34  ;;  %v1046_v13 = vrot.slane %v1045_v51, 4  ;;  %v1084_v25 = vshll.u32 %v2462_v47, 16  ;;  %v1090_v43 = vshll.u32 %v1841_v3, 16  ;;  %v287_v46 = vld [vmem:[%s2270_s10 + $0x4] sm:$0x1] }
  0x2a   : > { %2049 = vmatpush3.bf16.msra.mxu0 %v2330_v26  ;;  %v1069_v33 = vrot.slane %v1067_v7, 4  ;;  %v1072_v34 = vrot.slane %v1070_v61, 5  ;;  %v1078_v30 = vrot.slane %v1076_v14, 5  ;;  %v1083_v45 = vrot.slane %v1081_v16, 4 }
  0x2b   : > { %v1060_v27 = vrot.slane %v1059_v5, 4  ;;  %2159 = vmatprep.subr.msk.bf16.mxu0 %vm376_vm0, %v2456_v41  ;;  %v1051_v26 = vsel %vm2394_vm4, %v1046_v13, %v1050_v44  ;;  %v1086_v51 = vrot.slane %v1084_v25, 5  ;;  %v555_v3 = vor.u32 %v2371_v49, %v2360_v39 }
  0x2c   : > { %v1073_v60 = vor.u32 %v1072_v34, %v1069_v33  ;;  %v558_v59 = vshll.u32 %v287_v46, 16  ;;  %v565_v44 = vrot.slane %v563_v35, 4  ;;  %v568_v16 = vrot.slane %v566_v40, 5  ;;  %v295_v46 = vld [vmem:[%s2270_s10 + $0x24] sm:$0x1] }
  0x2d   : > { %2005 = vmatmul.mubr.msk.bf16.gmra.mrb[4].mxu1 %vm363_vm1, %v1862_v20  ;;  %v1065_v5 = vsel %vm2394_vm4, %v1060_v27, %v1064_v55  ;;  %v1092_v20 = vrot.slane %v1090_v43, 5  ;;  %v1087_v61 = vor.u32 %v1086_v51, %v1083_v45  ;;  %v556_v14 = vrot.slane %v555_v3, 4  ;;  %v291_v55 = vld [vmem:[%s2270_s10 + $0x14] sm:$0x1]  ;;  %v293_v43 = vld [vmem:[%s2270_s10 + $0x1c] sm:$0x1] }
  0x2e   : > { %v1897_v7 = vcombine.low %v1051_v26, %v1065_v5  ;;  %v1074_v13 = vrot.slane %v1073_v60, 4  ;;  %v572_v25 = vshll.u32 %v289_v6, 16  ;;  %v560_v33 = vrot.slane %v558_v59, 5 }
  0x2f   : > { %v1088_v27 = vrot.slane %v1087_v61, 4  ;;  %v1904_v39 = vcombine.low %v2341_v29, %v2369_v48  ;;  %v579_v49 = vrot.slane %v577_v53, 4  ;;  %v569_v60 = vor.u32 %v568_v16, %v565_v44  ;;  %v297_v61 = vld [vmem:[%s2270_s10 + $0x2c] sm:$0x1] }
  0x30   : > { %2044 = vmatprep.mubr.msk.bf16.mxu0 %vm363_vm1, %v1897_v7  ;;  %v1079_v35 = vsel %vm2394_vm4, %v1074_v13, %v1078_v30  ;;  %v574_v34 = vrot.slane %v572_v25, 5  ;;  %v582_v40 = vrot.slane %v580_v57, 5  ;;  %v561_v59 = vsel %vm2394_vm4, %v556_v14, %v560_v33  ;;  %v299_v14 = vld [vmem:[%s2270_s10 + $0x34] sm:$0x1] }
  0x31   : > { %v1093_v6 = vsel %vm2394_vm4, %v1088_v27, %v1092_v20  ;;  %v586_v29 = vshll.u32 %v291_v55, 16  ;;  %v593_v53 = vrot.slane %v591_v62, 4  ;;  %v570_v30 = vrot.slane %v569_v60, 4 }
  0x32   : > { %v1898_v26 = vcombine.low %v1079_v35, %v1093_v6  ;;  %v583_v45 = vor.u32 %v582_v40, %v579_v49  ;;  %v596_v51 = vrot.slane %v594_v21, 5  ;;  %v600_v57 = vshll.u32 %v293_v43, 16  ;;  %v301_v43 = vld [vmem:[%s2270_s10 + $0x3c] sm:$0x1] }
  0x33   : > { %v588_v48 = vrot.slane %v586_v29, 5  ;;  %v607_v5 = vrot.slane %v605_v54, 4  ;;  %v610_v20 = vrot.slane %v608_v56, 5  ;;  %v2516_v62 = vsel %vm2394_vm4, %v570_v30, %v574_v34 }
  0x34   : > { %2045 = vmatmul.mubr.msk.bf16.gmra.mrb[4].mxu0 %vm363_vm1, %v1898_v26  ;;  %v584_v3 = vrot.slane %v583_v45, 4  ;;  %v597_v7 = vor.u32 %v596_v51, %v593_v53  ;;  %v614_v44 = vshll.u32 %v295_v46, 16  ;;  %v1868_v21 = vcombine.low %v561_v59, %v2516_v62 }
  0x35   : > { %2050 = vmatprep.mubr.msk.bf16.mxu0 %vm363_vm1, %v1904_v39  ;;  %v602_v13 = vrot.slane %v600_v57, 5  ;;  %v611_v54 = vor.u32 %v610_v20, %v607_v5  ;;  %v621_v56 = vrot.slane %v619_v63, 4  ;;  %v624_v27 = vrot.slane %v622_v2, 5  ;;  %v302_v57 = vld [vmem:[%s2270_s10 + $0x40] sm:$0xf] }
  0x36   : > { %v2526_v16 = vsel %vm2394_vm4, %v584_v3, %v588_v48  ;;  %v598_v25 = vrot.slane %v597_v7, 4  ;;  %v616_v55 = vrot.slane %v614_v44, 5  ;;  %v650_v33 = vshll.u32 %v2438_v8, 16  ;;  %2010 = vmatprep.mubr.msk.bf16.mxu1 %vm363_vm1, %v1868_v21  ;;  %v1921_v5 = vld [vmem:[%s2666_s1 + $0x10] sm:$0x3] }
  0x37   : > { %v612_v39 = vrot.slane %v611_v54, 4  ;;  %v628_v49 = vshll.u32 %v297_v61, 16  ;;  %v2674_v35 = vshrl.u32 %v2431_v4, 16  ;;  %v625_v34 = vor.u32 %v624_v27, %v621_v56 }
  0x38   : > { %v2536_v60 = vsel %vm2394_vm4, %v598_v25, %v602_v13  ;;  %v2675_v40 = vshll.u32 %v2431_v4, 16  ;;  %v642_v2 = vshll.u32 %v299_v14, 16  ;;  %v1906_v53 = vcombine.low %v2408_v31, %v2431_v4  ;;  %v303_v25 = vld [vmem:[%s2270_s10 + $0x44] sm:$0x1] }
  0x39   : > { %v635_v63 = vrot.slane %v2674_v35, 4  ;;  %v1869_v59 = vcombine.low %v2526_v16, %v2536_v60  ;;  %v630_v29 = vrot.slane %v628_v49, 5  ;;  %v2676_v46 = vshrl.u32 %v2438_v8, 16 }
  0x3a   : > { %v638_v6 = vrot.slane %v2675_v40, 5  ;;  %v1313_v30 = vsel %vm376_vm0, %v2456_v41, 0  ;;  %v2551_v45 = vsel %vm2394_vm4, %v612_v39, %v616_v55  ;;  %v626_v51 = vrot.slane %v625_v34, 4  ;;  %v1542_v41 = vld [vmem:[%s2667_s2] sm:$0x3] }
  0x3b   : > { %v649_v26 = vrot.slane %v2676_v46, 4  ;;  %2011 = vmatmul.mubr.msk.bf16.vlgmr.msra.gmra.mrb[0].mxu1 %vm363_vm1, %v1869_v59  ;;  %v644_v31 = vrot.slane %v642_v2, 5  ;;  %v652_v4 = vrot.slane %v650_v33, 5  ;;  %v656_v20 = vshll.u32 %v301_v43, 16 }
  0x3c   : > { %v639_v48 = vor.u32 %v638_v6, %v635_v63  ;;  %v1389_v3 = vshrl.u32 %v302_v57, 16  ;;  %v2677_v7 = vcombine.low %v2374_v52, %v2404_v15  ;;  %2019 = vmatpush3.bf16.msra.mxu1 %v2358_v38  ;;  %v631_v61 = vsel %vm2394_vm4, %v626_v51, %v630_v29 }
  0x3d   : > { %v1392_v21 = vshll.u32 %v302_v57, 16  ;;  %v1870_v13 = vcombine.low %v2551_v45, %v631_v61  ;;  %v653_v54 = vor.u32 %v652_v4, %v649_v26  ;;  %v658_v56 = vrot.slane %v656_v20, 5  ;;  %2161 = vmatprep.subr.msk.bf16.mxu1 %vm376_vm0, %v1542_v41 }
  0x3e   : > { %2051 = vmatmul.mubr.msk.bf16.vlgmr.msra.gmra.mrb[0].mxu0 %vm363_vm1, %v2677_v7  ;;  %v640_v44 = vrot.slane %v639_v48, 4  ;;  %v1391_v14 = vrot.slane %v1389_v3, 4  ;;  %v1907_v15 = vcombine.low %v2438_v8, %v302_v57  ;;  %v1398_v33 = vshll.u32 %v303_v25, 16 }
  0x3f   : > { %2059 = vmatpush3.bf16.msra.mxu0 %v1313_v30  ;;  %2054 = vmatprep.mubr.msk.bf16.mxu0 %vm363_vm1, %v1906_v53  ;;  %v1394_v55 = vrot.slane %v1392_v21, 5  ;;  %v654_v52 = vrot.slane %v653_v54, 4  ;;  %v1913_v39 = vcombine.low %v2276_v9, %v2279_v10  ;;  %v1877_v35 = vcombine.low %v2344_v32, %v2353_v37 }
  0x40   : > { %2160 = vmatprep.subr.msk.bf16.mxu0 %vm376_vm0, %v1921_v5  ;;  %2014 = vmatprep.mubr.msk.bf16.mxu1 %vm363_vm1, %v1870_v13  ;;  %v645_v38 = vsel %vm2394_vm4, %v640_v44, %v644_v31  ;;  %v1400_v43 = vrot.slane %v1398_v33, 5  ;;  %v1914_v9 = vcombine.low %v2282_v11, %v2285_v12  ;;  %v1878_v10 = vcombine.low %v2380_v58, %v2390_v0  ;;  %v1825_v11 = vld [vmem:[%s2270_s10 + $0x88] sm:$0xf] }
  0x41   : > { %v1395_v27 = vor.u32 %v1394_v55, %v1391_v14  ;;  %v659_v49 = vsel %vm2394_vm4, %v654_v52, %v658_v56  ;;  %v1422_v32 = vsel %vm376_vm0, %v1921_v5, 0  ;;  %v1544_v37 = vsel %vm376_vm0, %v1542_v41, 0 }
  0x42   : > { %v1871_v63 = vcombine.low %v645_v38, %v659_v49  ;;  %v1879_v40 = vcombine.low %v2413_v42, %v2421_v50  ;;  %v1880_v12 = vcombine.low %v2451_v36, %v2462_v47  ;;  %v1916_v58 = vcombine.low %v2325_v24, %v1825_v11 }
  0x43   : > { %v1396_v34 = vrot.slane %v1395_v27, 4  ;;  %v1922_v0 = vcombine.low %v2516_v62, %v2526_v16  ;;  %v1923_v19 = vcombine.low %v2536_v60, %v2551_v45  ;;  %v1924_v23 = vcombine.low %v631_v61, %v645_v38 }
  0x44   : > { %2015 = vmatmul.mubr.msk.bf16.gmra.mrb[4].mxu1 %vm363_vm1, %v1871_v63 }
  0x45   : > { %v1401_v8 = vsel %vm2394_vm4, %v1396_v34, %v1400_v43  ;;  %2020 = vmatprep.mubr.msk.bf16.mxu1 %vm363_vm1, %v1877_v35 }
  0x46   : > { %2055 = vmatmul.mubr.msk.bf16.gmra.mrb[4].mxu0 %vm363_vm1, %v1907_v15  ;;  %v1925_v24 = vcombine.low %v659_v49, %v1401_v8 }
  0x47   : > { %2060 = vmatprep.mubr.msk.bf16.mxu0 %vm363_vm1, %v1913_v39 }
  0x4c   : > { %2021 = vmatmul.mubr.msk.bf16.vlgmr.msra.gmra.mrb[0].mxu1 %vm363_vm1, %v1878_v10 }
  0x4d   : > { %2079 = vmatpush3.bf16.msra.mxu1 %v1544_v37  ;;  %2024 = vmatprep.mubr.msk.bf16.mxu1 %vm363_vm1, %v1879_v40 }
  0x4e   : > { %2061 = vmatmul.mubr.msk.bf16.vlgmr.msra.gmra.mrb[0].mxu0 %vm363_vm1, %v1914_v9 }
  0x4f   : > { %2069 = vmatpush3.bf16.msra.mxu0 %v1422_v32  ;;  %2064 = vmatprep.mubr.msk.bf16.mxu0 %vm363_vm1, %v1915_v1 }
  0x54   : > { %2025 = vmatmul.mubr.msk.bf16.gmra.mrb[4].mxu1 %vm363_vm1, %v1880_v12 }
  0x55   : > { %2080 = vmatprep.mubr.msk.bf16.mxu1 %vm363_vm1, %v2297_v17 }
  0x56   : > { %2065 = vmatmul.mubr.msk.bf16.gmra.mrb[4].mxu0 %vm363_vm1, %v1916_v58 }
  0x57   : > { %2070 = vmatprep.mubr.msk.bf16.mxu0 %vm363_vm1, %v1922_v0 }
  0x5c   : > { %2081 = vmatmul.mubr.msk.bf16.vlgmr.msra.gmra.mrb[8].mxu1 %vm363_vm1, %v2301_v18 }
  0x5d   : > { %2084 = vmatprep.mubr.msk.bf16.mxu1 %vm363_vm1, %v2317_v22 }
  0x5e   : > { %2071 = vmatmul.mubr.msk.bf16.vlgmr.msra.gmra.mrb[0].mxu0 %vm363_vm1, %v1923_v19 }
  0x5f   : > { %2074 = vmatprep.mubr.msk.bf16.mxu0 %vm363_vm1, %v1924_v23 }
  0x64   : > { %2085 = vmatmul.mubr.msk.bf16.gmra.mrb[12].mxu1 %vm363_vm1, %v2338_v28 }
  0x66   : > { %2075 = vmatmul.mubr.msk.bf16.gmra.mrb[4].mxu0 %vm363_vm1, %v1925_v24 }
 0x11f   : > { %v2022_v17 = vpop.f32.mrb[0].mxu1 }
 0x120   : > { %v833_v42 = vpop.f32.mrb[1].mxu1 }
 0x121   : > { %v2023_v50 = vpop.f32.mrb[2].mxu1 }
 0x122   : > { %v836_v36 = vpop.f32.mrb[3].mxu1 }
 0x127   : > { %v2026_v47 = vpop.f32.mrb[4].mxu1 }
 0x128   : > { %v849_v62 = vpop.f32.mrb[5].mxu1 }
 0x129   : > { %v2027_v16 = vpop.f32.mrb[6].mxu1 }
 0x12a   : > { %v2625_v60 = vpop.f32.mrb[7].mxu1 }
 0x12f   : > { %v2082_v22 = vpop.f32.mrb[8].mxu1 }
 0x130   : > { %1613 = vst [vmem:[%s2631_s28 + $0x10] sm:$0xff] %v2082_v22  ;;  %v1580_v2 = vpop.f32.mrb[9].mxu1  ;;  %v1634_v5 = vmul.f32 %v2082_v22, %v2082_v22 }
 0x131   : > { %v2072_v18 = vpop.f32.mrb[0].mxu0  ;;  %1611 = vst [vmem:[%s2631_s28] sm:$0xff] %v1580_v2  ;;  %v2083_v53 = vpop.f32.mrb[10].mxu1  ;;  %v1632_v45 = vmul.f32 %v1580_v2, %v1580_v2 }
 0x132   : > { %v2088_v28 = vadd.f32 %v2072_v18, %v2022_v17  ;;  %v1458_v6 = vpop.f32.mrb[1].mxu0  ;;  %1614 = vst [vmem:[%s2631_s28 + $0x18] sm:$0xff] %v2083_v53  ;;  %v1583_v30 = vpop.f32.mrb[11].mxu1  ;;  %v1635_v25 = vmul.f32 %v2083_v53, %v2083_v53 }
 0x133   : > { %v2089_v59 = vadd.f32 %v1458_v6, %v833_v42  ;;  %v2073_v29 = vpop.f32.mrb[2].mxu0  ;;  %1612 = vst [vmem:[%s2631_s28 + $0x8] sm:$0xff] %v1583_v30  ;;  %v1619_v48 = vadd.f32 %v1583_v30, %v1580_v2  ;;  %v1633_v57 = vmul.f32 %v1583_v30, %v1583_v30 }
 0x134   : > { %1499 = vst [vmem:[%s2636_s7 + $0x10] sm:$0xff] %v2088_v28  ;;  %v2090_v46 = vadd.f32 %v2073_v29, %v2023_v50  ;;  %v1461_v26 = vpop.f32.mrb[3].mxu0  ;;  %v1520_v7 = vmul.f32 %v2088_v28, %v2088_v28 }
 0x135   : > { %1497 = vst [vmem:[%s2636_s7] sm:$0xff] %v2089_v59  ;;  %v2091_v51 = vadd.f32 %v1461_v26, %v836_v36  ;;  %v1518_v31 = vmul.f32 %v2089_v59, %v2089_v59  ;;  %v1620_v3 = vadd.f32 %v2082_v22, %v1619_v48  ;;  %v1640_v41 = vadd.f32 %v1633_v57, %v1632_v45 }
 0x136   : > { %1500 = vst [vmem:[%s2636_s7 + $0x18] sm:$0xff] %v2090_v46  ;;  %v1521_v14 = vmul.f32 %v2090_v46, %v2090_v46 }
 0x137   : > { %1498 = vst [vmem:[%s2636_s7 + $0x8] sm:$0xff] %v2091_v51  ;;  %v1505_v4 = vadd.f32 %v2091_v51, %v2089_v59  ;;  %v1519_v20 = vmul.f32 %v2091_v51, %v2091_v51  ;;  %v1641_v21 = vadd.f32 %v1640_v41, %v1634_v5  ;;  %v2086_v54 = vpop.f32.mrb[12].mxu1  ;;  %v1621_v56 = vadd.f32 %v2083_v53, %v1620_v3 }
 0x138   : > { %1617 = vst [vmem:[%s2631_s28 + $0x30] sm:$0xff] %v2086_v54  ;;  %v1596_v52 = vpop.f32.mrb[13].mxu1  ;;  %v1638_v24 = vmul.f32 %v2086_v54, %v2086_v54 }
 0x139   : > { %v1506_v61 = vadd.f32 %v2088_v28, %v1505_v4  ;;  %v1526_v44 = vadd.f32 %v1519_v20, %v1518_v31  ;;  %v2076_v13 = vpop.f32.mrb[4].mxu0  ;;  %1615 = vst [vmem:[%s2631_s28 + $0x20] sm:$0xff] %v1596_v52  ;;  %v1622_v39 = vadd.f32 %v1621_v56, %v1596_v52  ;;  %v2087_v35 = vpop.f32.mrb[14].mxu1  ;;  %v1636_v63 = vmul.f32 %v1596_v52, %v1596_v52 }
 0x13a   : > { %v2092_v55 = vadd.f32 %v2076_v13, %v2026_v47  ;;  %v1474_v38 = vpop.f32.mrb[5].mxu0  ;;  %v1642_v34 = vadd.f32 %v1641_v21, %v1635_v25  ;;  %1618 = vst [vmem:[%s2631_s28 + $0x38] sm:$0xff] %v2087_v35  ;;  %v1599_v9 = vpop.f32.mrb[15].mxu1 }
 0x13b   : > { %v1527_v15 = vadd.f32 %v1526_v44, %v1520_v7  ;;  %v2093_v27 = vadd.f32 %v1474_v38, %v849_v62  ;;  %v1507_v33 = vadd.f32 %v2090_v46, %v1506_v61  ;;  %v2077_v49 = vpop.f32.mrb[6].mxu0  ;;  %1616 = vst [vmem:[%s2631_s28 + $0x28] sm:$0xff] %v1599_v9  ;;  %v1623_v11 = vadd.f32 %v1622_v39, %v1599_v9 }
 0x13c   : > { %1503 = vst [vmem:[%s2636_s7 + $0x30] sm:$0xff] %v2092_v55  ;;  %v2094_v43 = vadd.f32 %v2077_v49, %v2027_v16  ;;  %v1477_v8 = vpop.f32.mrb[7].mxu0  ;;  %v1643_v40 = vadd.f32 %v1642_v34, %v1636_v63  ;;  %v1637_v58 = vmul.f32 %v1599_v9, %v1599_v9  ;;  %v1524_v42 = vmul.f32 %v2092_v55, %v2092_v55 }
 0x13d   : > { %1501 = vst [vmem:[%s2636_s7 + $0x20] sm:$0xff] %v2093_v27  ;;  %v1508_v10 = vadd.f32 %v2093_v27, %v1507_v33  ;;  %v1522_v32 = vmul.f32 %v2093_v27, %v2093_v27  ;;  %v1528_v37 = vadd.f32 %v1527_v15, %v1521_v14  ;;  %v2095_v1 = vadd.f32 %v1477_v8, %v2625_v60 }
 0x13e   : > { %1504 = vst [vmem:[%s2636_s7 + $0x38] sm:$0xff] %v2094_v43  ;;  %v1624_v23 = vadd.f32 %v2086_v54, %v1623_v11  ;;  %v1644_v17 = vadd.f32 %v1643_v40, %v1637_v58  ;;  %v1639_v62 = vmul.f32 %v2087_v35, %v2087_v35  ;;  %v1525_v18 = vmul.f32 %v2094_v43, %v2094_v43 }
 0x13f   : > { %v1529_v12 = vadd.f32 %v1528_v37, %v1522_v32  ;;  %1502 = vst [vmem:[%s2636_s7 + $0x28] sm:$0xff] %v2095_v1  ;;  %v1509_v0 = vadd.f32 %v2095_v1, %v1508_v10  ;;  %v1523_v19 = vmul.f32 %v2095_v1, %v2095_v1 }
 0x140   : > { %v1625_v47 = vadd.f32 %v2087_v35, %v1624_v23  ;;  %v1645_v16 = vadd.f32 %v1644_v17, %v1638_v24 }
 0x141   : > { %v1510_v50 = vadd.f32 %v2092_v55, %v1509_v0  ;;  %v1530_v36 = vadd.f32 %v1529_v12, %v1523_v19 }
 0x142   : > { %v1626_v6 = vrot.slane %v1625_v47, 4  ;;  %v1646_v60 = vadd.f32 %v1645_v16, %v1639_v62 }
 0x143   : > { %v1511_v22 = vadd.f32 %v2094_v43, %v1510_v50  ;;  %v1531_v28 = vadd.f32 %v1530_v36, %v1524_v42 }
 0x144   : > { %v1627_v29 = vadd.f32 %v1626_v6, %v1625_v47  ;;  %v1647_v53 = vrot.slane %v1646_v60, 4 }
 0x145   : > { %v1512_v2 = vrot.slane %v1511_v22, 4  ;;  %v1532_v59 = vadd.f32 %v1531_v28, %v1525_v18 }
 0x146   : > { %v1628_v30 = vrot.slane %v1627_v29, 2  ;;  %v1648_v45 = vadd.f32 %v1647_v53, %v1646_v60 }
 0x147   : > { %v1513_v46 = vadd.f32 %v1512_v2, %v1511_v22  ;;  %v1533_v26 = vrot.slane %v1532_v59, 4 }
 0x148   : > { %v1629_v57 = vadd.f32 %v1628_v30, %v1627_v29  ;;  %v1649_v5 = vrot.slane %v1648_v45, 2 }
 0x149   : > { %v1514_v51 = vrot.slane %v1513_v46, 2  ;;  %v1534_v48 = vadd.f32 %v1533_v26, %v1532_v59 }
 0x14a   : > { %v1630_v20 = vrot.slane %v1629_v57, 1  ;;  %v1650_v3 = vadd.f32 %v1649_v5, %v1648_v45 }
 0x14b   : > { %v1515_v31 = vadd.f32 %v1514_v51, %v1513_v46  ;;  %v1535_v4 = vrot.slane %v1534_v48, 2 }
 0x14c   : > { %v1651_v61 = vrot.slane %v1650_v3, 1  ;;  %v1631_v21 = vadd.f32 %v1630_v20, %v1629_v57 }
 0x14d   : > { %v1516_v41 = vrot.slane %v1515_v31, 1  ;;  %v1536_v7 = vadd.f32 %v1535_v4, %v1534_v48 }
 0x14e   : > { %v1652_v13 = vadd.f32 %v1651_v61, %v1650_v3 }
 0x14f   : > { %v1537_v44 = vrot.slane %v1536_v7, 1  ;;  %v1517_v54 = vadd.f32 %v1516_v41, %v1515_v31 }
 0x150   : > { %v1653_v14 = vsel %vm1539_vm5, %v1631_v21, %v1652_v13 }
 0x151   : > { %v1538_v56 = vadd.f32 %v1537_v44, %v1536_v7  ;;  %1654 = vst [vmem:[%s284_s11] sm:$0x3] %v1653_v14 }
 0x153   : > { %v1540_v25 = vsel %vm1539_vm5, %v1517_v54, %v1538_v56 }
 0x154   : > { %1541 = vst [vmem:[%s275_s14] sm:$0x3] %v1540_v25 }
 0x155 PF: > { %s17_s21 = sadd.s32 1, %s2201_s21  }
 0x156   : > { %p14_p4 = scmp.ge.s32.totalorder %s17_s21, 4  }
 0x158   :  { %16 = sbr.rel (!%p14_p4) target bundleno = 1 (0x1), region = 109 }

// kernel: _lambda_.4
= control target key start
LH: loop header
LB: loop body
LE: loop exit
PB: predicated region body
PF: predicated region fallthrough
CT: control target
= control target key end

     0   :  { %s2517_s18 = smov 0   ;;  %s2926_s0 = inlined_call_operand.vmem [shape: f32[2,8,8,128], index: 0, kind: input, shape index: {}]   ;;  %s2927_s1 = inlined_call_operand.vmem [shape: f32[1,128], index: 1, kind: input, shape index: {}]   ;;  %s2928_s2 = inlined_call_operand.vmem [shape: f32[1,128], index: 2, kind: input, shape index: {}]   ;;  %s2929_s3 = inlined_call_operand.vmem [shape: bf16[9,128,128], index: 3, kind: input, shape index: {}]   ;;  %s2930_s4 = inlined_call_operand.vmem [shape: f32[2,8,8,128], index: 4, kind: output, shape index: {0}]   ;;  %s2931_s5 = inlined_call_operand.vmem [shape: f32[2,2,128], index: 5, kind: output, shape index: {1}]  }
   0x1 LB: > { %s1777_s19 = sadd.s32 4294967295, %s2484_s18   ;;  %p1781_p0 = scmp.ge.s32.totalorder %s2484_s18, 1  ;;  %s2484_s18 = sphi %s2517_s18, %s16_s18  }
   0x2   : > { %p190_p1 = scmp.lt.s32.totalorder %s2484_s18, 3 }
   0x4   : > { %p191_p2 = pnand %p1781_p0, %p190_p1 }
   0x5   : > { %v2406_v0 = vld [vmem:[%s2929_s3 + $0x40] sm:$0xff] (!%p191_p2)   ;;  %v2408_v2 = vld [vmem:[%s2929_s3 + $0x48] sm:$0xff] (!%p191_p2)   ;;  %p2536_p3 = scmp.lt.s32.totalorder (!%p191_p2), %s1777_s19, 1  ;;  %v2486_v3 = vmov (!%p191_p2), 0.0   ;;  %v2410_v5 = vld [vmem:[%s2929_s3 + $0x50] sm:$0xff] (!%p191_p2)   ;;  %vm1688_vm0 = vcmask (!%p191_p2), 1040384  }
   0x6   : > { %194 = sbr.rel (%p191_p2) target bundleno = 414 (0x19e), region = 36  ;;  %v2407_v1 = vld [vmem:[%s2929_s3 + $0x100] sm:$0xff] (!%p191_p2)   ;;  %2101 = vmatprep.subr.bf16.mxu1 (!%p191_p2), %v2406_v0  ;;  %283 = vst [vmem:[#allocation2] sm:$0xff] (!%p191_p2), %v2486_v3  ;;  %284 = vst [vmem:[#allocation2 + $0x8] sm:$0x3] (!%p191_p2), %v2486_v3  ;;  %v2409_v4 = vld [vmem:[%s2929_s3 + $0x108] sm:$0xff] (!%p191_p2)  }
   0x7   : > { %285 = vst [vmem:[#allocation2 + $0x10] sm:$0xff] (!%p191_p2), %v2486_v3  ;;  %286 = vst [vmem:[#allocation2 + $0x18] sm:$0x3] (!%p191_p2), %v2486_v3  ;;  %2197 = vmatprep.subr.bf16.mxu0 (!%p191_p2), %v2407_v1  ;;  %2102 = vmatpush3.bf16.msra.mxu1 (!%p191_p2), %v2406_v0  ;;  %v2411_v6 = vld [vmem:[%s2929_s3 + $0x110] sm:$0xff] (!%p191_p2)   ;;  %v2412_v7 = vld [vmem:[%s2929_s3 + $0x58] sm:$0xff] (!%p191_p2)  }
   0x8   : > { %287 = vst [vmem:[#allocation2 + $0x20] sm:$0xff] (!%p191_p2), %v2486_v3  ;;  %288 = vst [vmem:[#allocation2 + $0x28] sm:$0x3] (!%p191_p2), %v2486_v3  ;;  %2198 = vmatpush3.bf16.msra.mxu0 (!%p191_p2), %v2407_v1  ;;  %2103 = vmatprep.subr.bf16.mxu1 (!%p191_p2), %v2408_v2  ;;  %v2413_v8 = vld [vmem:[%s2929_s3 + $0x118] sm:$0xff] (!%p191_p2)   ;;  %v2414_v9 = vld [vmem:[%s2929_s3 + $0x60] sm:$0xff] (!%p191_p2)  }
   0x9   : > { %289 = vst [vmem:[#allocation2 + $0x30] sm:$0xff] (!%p191_p2), %v2486_v3  ;;  %290 = vst [vmem:[#allocation2 + $0x38] sm:$0x3] (!%p191_p2), %v2486_v3  ;;  %2199 = vmatprep.subr.bf16.mxu0 (!%p191_p2), %v2409_v4  ;;  %v2415_v10 = vld [vmem:[%s2929_s3 + $0x120] sm:$0xff] (!%p191_p2)   ;;  %v2416_v11 = vld [vmem:[%s2929_s3 + $0x68] sm:$0xff] (!%p191_p2)  }
   0xa   : > { %291 = vst [vmem:[#allocation2 + $0x40] sm:$0xff] (!%p191_p2), %v2486_v3  ;;  %292 = vst [vmem:[#allocation2 + $0x48] sm:$0x3] (!%p191_p2), %v2486_v3  ;;  %v2601_v12 = vld [vmem:[%s2927_s1] ss:$0 sm:$0xff] (!%p191_p2)  ;;  %v2417_v15 = vld [vmem:[%s2929_s3 + $0x128] sm:$0xff] (!%p191_p2)  }
   0xb   : > { %293 = vst [vmem:[#allocation2 + $0x50] sm:$0xff] (!%p191_p2), %v2486_v3  ;;  %294 = vst [vmem:[#allocation2 + $0x58] sm:$0x3] (!%p191_p2), %v2486_v3  ;;  %2104 = vmatpush3.bf16.msra.mxu1 (!%p191_p2), %v2408_v2  ;;  %v2606_v13 = vld [vmem:[%s2928_s2] ss:$0 sm:$0xff] (!%p191_p2)  ;;  %v2418_v17 = vld [vmem:[%s2929_s3 + $0x70] sm:$0xff] (!%p191_p2)  }
   0xc   : > { %295 = vst [vmem:[#allocation2 + $0x60] sm:$0xff] (!%p191_p2), %v2486_v3  ;;  %296 = vst [vmem:[#allocation2 + $0x68] sm:$0x3] (!%p191_p2), %v2486_v3  ;;  %2200 = vmatpush3.bf16.msra.mxu0 (!%p191_p2), %v2409_v4  ;;  %2105 = vmatprep.subr.bf16.mxu1 (!%p191_p2), %v2410_v5  ;;  %v2419_v25 = vld [vmem:[%s2929_s3 + $0x130] sm:$0xff] (!%p191_p2)   ;;  %v2420_v33 = vld [vmem:[%s2929_s3 + $0x78] sm:$0xff] (!%p191_p2)  }
   0xd   : > { %297 = vst [vmem:[#allocation2 + $0x70] sm:$0xff] %v2486_v3  ;;  %298 = vst [vmem:[#allocation2 + $0x78] sm:$0x3] %v2486_v3  ;;  %s2934_s19 = smov (!%p2536_p3, %s1777_s19), 1  ;;  %2201 = vmatprep.subr.bf16.mxu0 %v2411_v6  ;;  %v340_v20 = vld [vmem:[#allocation2 + $0x1] sm:$0xff]  ;;  %v2421_v35 = vld [vmem:[%s2929_s3 + $0x138] sm:$0xff]  }
   0xe   : > { %299 = vst [vmem:[#allocation2 + $0x80] sm:$0xff] %v2486_v3  ;;  %300 = vst [vmem:[#allocation2 + $0x88] sm:$0x3] %v2486_v3  ;;  %s1991_s12 = sshll.u32 %s2934_s19, 6  ;;  %v2422_v38 = vld [vmem:[%s2929_s3] sm:$0xff]   ;;  %v2424_v43 = vld [vmem:[%s2929_s3 + $0x8] sm:$0xff]  }
   0xf   : > { %301 = vst [vmem:[#allocation2 + $0x90] sm:$0xff] %v2486_v3  ;;  %302 = vst [vmem:[#allocation2 + $0x98] sm:$0x3] %v2486_v3  ;;  %2106 = vmatpush3.bf16.msra.mxu1 %v2410_v5  ;;  %s2593_s21 = scalar_lea.vmem %s2926_s0, %s1991_s12  ;;  %v2423_v39 = vld [vmem:[%s2929_s3 + $0x140] sm:$0xff]   ;;  %v2425_v46 = vld [vmem:[%s2929_s3 + $0x148] sm:$0xff]   ;;  %s231_s20 = scalar_lea.vmem %s2930_s4, %s1991_s12 }
  0x10   : > { %2202 = vmatpush3.bf16.msra.mxu0 %v2411_v6  ;;  %2107 = vmatprep.subr.bf16.mxu1 %v2412_v7  ;;  %v239_v14 = vld [vmem:[%s2593_s21] sm:$0xff]  ;;  %v240_v18 = vld [vmem:[%s2593_s21 + $0x8] sm:$0xff]  ;;  %v241_v22 = vld [vmem:[%s2593_s21 + $0x10] sm:$0xff]  ;;  %s1786_s12 = sshll.u32 %s2934_s19, 1 }
  0x11   : > { %2203 = vmatprep.subr.bf16.mxu0 %v2413_v8  ;;  %v253_v16 = vmul.f32 %v2601_v12, %v239_v14  ;;  %v254_v21 = vmul.f32 %v2601_v12, %v240_v18  ;;  %v255_v23 = vmul.f32 %v2601_v12, %v241_v22  ;;  %v242_v24 = vld [vmem:[%s2593_s21 + $0x18] sm:$0xff]  ;;  %v243_v41 = vld [vmem:[%s2593_s21 + $0x20] sm:$0xff]  ;;  %v244_v45 = vld [vmem:[%s2593_s21 + $0x28] sm:$0xff]  ;;  %s235_s24 = scalar_lea.vmem %s2931_s5, %s1786_s12 }
  0x12   : > { %v256_v28 = vmul.f32 %v2601_v12, %v242_v24  ;;  %v257_v44 = vmul.f32 %v2601_v12, %v243_v41  ;;  %v258_v47 = vmul.f32 %v2601_v12, %v244_v45  ;;  %v245_v49 = vld [vmem:[%s2593_s21 + $0x30] sm:$0xff]  ;;  %v246_v50 = vld [vmem:[%s2593_s21 + $0x38] sm:$0xff]  ;;  %v2439_v22 = vld [vmem:[%s2929_s3 + $0x180] sm:$0xff]  }
  0x13   : > { %2108 = vmatpush3.bf16.msra.mxu1 %v2412_v7  ;;  %v267_v19 = vadd.f32 %v2606_v13, %v253_v16  ;;  %v268_v27 = vadd.f32 %v2606_v13, %v254_v21  ;;  %v269_v29 = vadd.f32 %v2606_v13, %v255_v23  ;;  %v259_v52 = vmul.f32 %v2601_v12, %v245_v49  ;;  %v2426_v55 = vld [vmem:[%s2929_s3 + $0x10] sm:$0xff]   ;;  %v2428_v4 = vld [vmem:[%s2929_s3 + $0x18] sm:$0xff]   ;;  %v2448_v49 = vld [vmem:[%s2929_s3 + $0xa8] sm:$0xff]  }
  0x14   : > { %2204 = vmatpush3.bf16.msra.mxu0 %v2413_v8  ;;  %2109 = vmatprep.subr.bf16.mxu1 %v2414_v9  ;;  %v270_v32 = vadd.f32 %v2606_v13, %v256_v28  ;;  %v271_v48 = vadd.f32 %v2606_v13, %v257_v44  ;;  %v272_v51 = vadd.f32 %v2606_v13, %v258_v47  ;;  %v2427_v59 = vld [vmem:[%s2929_s3 + $0x150] sm:$0xff]   ;;  %v2429_v7 = vld [vmem:[%s2929_s3 + $0x158] sm:$0xff]   ;;  %v2446_v47 = vld [vmem:[%s2929_s3 + $0xa0] sm:$0xff]  }
  0x15   : > { %2205 = vmatprep.subr.bf16.mxu0 %v2415_v10  ;;  %v275_v26 = vmax.f32 %v267_v19, 0.0  ;;  %v276_v31 = vmax.f32 %v268_v27, 0.0  ;;  %v277_v34 = vmax.f32 %v269_v29, 0.0  ;;  %v260_v53 = vmul.f32 %v2601_v12, %v246_v50  ;;  %v2432_v12 = vld [vmem:[%s2929_s3 + $0x28] sm:$0xff]   ;;  %v2434_v14 = vld [vmem:[%s2929_s3 + $0x30] sm:$0xff]   ;;  %v2436_v16 = vld [vmem:[%s2929_s3 + $0x38] sm:$0xff]  }
  0x16   : > { %v278_v37 = vmax.f32 %v270_v32, 0.0  ;;  %v279_v54 = vmax.f32 %v271_v48, 0.0  ;;  %v280_v56 = vmax.f32 %v272_v51, 0.0  ;;  %v273_v57 = vadd.f32 %v2606_v13, %v259_v52  ;;  %v2440_v27 = vld [vmem:[%s2929_s3 + $0x88] sm:$0xff]   ;;  %v2444_v44 = vld [vmem:[%s2929_s3 + $0x98] sm:$0xff]   ;;  %v2447_v48 = vld [vmem:[%s2929_s3 + $0x1a0] sm:$0xff]  }
  0x17   : > { %2110 = vmatpush3.bf16.msra.mxu1 %v2414_v9  ;;  %304 = vst [vmem:[#allocation2 + $0x11] sm:$0xff] %v275_v26  ;;  %v348_v30 = vpack.c.bf16 %v275_v26, %v340_v20  ;;  %305 = vst [vmem:[#allocation2 + $0x21] sm:$0xff] %v276_v31  ;;  %v903_v36 = vpack.c.bf16 %v276_v31, %v275_v26  ;;  %v2641_v40 = vpack.c.bf16 %v277_v34, %v276_v31  ;;  %v2438_v20 = vld [vmem:[%s2929_s3 + $0x80] sm:$0xff]   ;;  %v2441_v31 = vld [vmem:[%s2929_s3 + $0x188] sm:$0xff]  }
  0x18   : > { %2206 = vmatpush3.bf16.msra.mxu0 %v2415_v10  ;;  %2111 = vmatprep.subr.bf16.mxu1 %v2416_v11  ;;  %306 = vst [vmem:[#allocation2 + $0x31] sm:$0xff] %v277_v34  ;;  %307 = vst [vmem:[#allocation2 + $0x41] sm:$0xff] %v278_v37  ;;  %v904_v42 = vpack.c.bf16 %v278_v37, %v277_v34  ;;  %v274_v58 = vadd.f32 %v2606_v13, %v260_v53  ;;  %v281_v62 = vmax.f32 %v273_v57, 0.0  ;;  %v2430_v10 = vld [vmem:[%s2929_s3 + $0x20] sm:$0xff]   ;;  %v2433_v13 = vld [vmem:[%s2929_s3 + $0x168] sm:$0xff]  }
  0x19   : > { %2207 = vmatprep.subr.bf16.mxu0 %v2417_v15  ;;  %2117 = vmatprep.mubr.bf16.mxu1 %v348_v30  ;;  %308 = vst [vmem:[#allocation2 + $0x51] sm:$0xff] %v279_v54  ;;  %v2668_v60 = vpack.c.bf16 %v279_v54, %v278_v37  ;;  %309 = vst [vmem:[#allocation2 + $0x61] sm:$0xff] %v280_v56  ;;  %v905_v61 = vpack.c.bf16 %v280_v56, %v279_v54  ;;  %v2442_v34 = vld [vmem:[%s2929_s3 + $0x90] sm:$0xff]   ;;  %v2445_v45 = vld [vmem:[%s2929_s3 + $0x198] sm:$0xff]  }
  0x1a   : > { %2213 = vmatprep.mubr.bf16.mxu0 %v903_v36  ;;  %v2670_v63 = vmax.f32 %v274_v58, 0.0  ;;  %310 = vst [vmem:[#allocation2 + $0x71] sm:$0xff] %v281_v62  ;;  %v2682_v5 = vpack.c.bf16 %v281_v62, %v280_v56  ;;  %v2449_v50 = vld [vmem:[%s2929_s3 + $0x1a8] sm:$0xff]   ;;  %v2450_v51 = vld [vmem:[%s2929_s3 + $0xb0] sm:$0xff]   ;;  %v2452_v53 = vld [vmem:[%s2929_s3 + $0xb8] sm:$0xff]  }
  0x1b   : > { %2112 = vmatpush3.bf16.msra.mxu1 %v2416_v11  ;;  %v2431_v11 = vld [vmem:[%s2929_s3 + $0x160] sm:$0xff]   ;;  %v2451_v52 = vld [vmem:[%s2929_s3 + $0x1b0] sm:$0xff]   ;;  %v2453_v54 = vld [vmem:[%s2929_s3 + $0x1b8] sm:$0xff]  }
  0x1c   : > { %2208 = vmatpush3.bf16.msra.mxu0 %v2417_v15  ;;  %2113 = vmatprep.subr.bf16.mxu1 %v2418_v17  ;;  %311 = vst [vmem:[#allocation2 + $0x81] sm:$0xff] %v2670_v63  ;;  %v906_v6 = vpack.c.bf16 %v2670_v63, %v281_v62  ;;  %v2435_v15 = vld [vmem:[%s2929_s3 + $0x170] sm:$0xff]   ;;  %v2455_v56 = vld [vmem:[%s2929_s3 + $0x1c0] sm:$0xff]   ;;  %v2456_v58 = vld [vmem:[%s2929_s3 + $0xc8] sm:$0xff]  }
  0x1d   : > { %2209 = vmatprep.subr.bf16.mxu0 %v2419_v25  ;;  %v2458_v62 = vld [vmem:[%s2929_s3 + $0xd0] sm:$0xff]  }
  0x1e   : > { %v2672_v0 = vld [vmem:[#allocation2 + $0x10] sm:$0xff]  ;;  %v2677_v2 = vld [vmem:[#allocation2 + $0x22] sm:$0xff] }
  0x1f   : > { %2114 = vmatpush3.bf16.msra.mxu1 %v2418_v17  ;;  %v2675_v1 = vld [vmem:[#allocation2 + $0x12] sm:$0xff]  ;;  %v320_v8 = vpack.c.bf16 %v2672_v0, %v2486_v3  ;;  %v2718_v18 = vld [vmem:[#allocation2 + $0x20] sm:$0xff] }
  0x20   : > { %2210 = vmatpush3.bf16.msra.mxu0 %v2419_v25  ;;  %2115 = vmatprep.subr.bf16.mxu1 %v2420_v33  ;;  %v1053_v9 = vpack.c.bf16 %v2677_v2, %v2675_v1  ;;  %v2437_v17 = vld [vmem:[%s2929_s3 + $0x178] sm:$0xff]   ;;  %v2720_v19 = vld [vmem:[#allocation2 + $0x30] sm:$0xff]  ;;  %v2730_v23 = vld [vmem:[#allocation2 + $0x42] sm:$0xff] }
  0x21   : > { %2211 = vmatprep.subr.bf16.mxu0 %v2421_v35  ;;  %v2725_v21 = vld [vmem:[#allocation2 + $0x32] sm:$0xff]  ;;  %v2732_v24 = vld [vmem:[#allocation2 + $0x40] sm:$0xff]  ;;  %v321_v26 = vpack.c.bf16 %v2720_v19, %v2718_v18 }
  0x22   : > { %v2734_v25 = vld [vmem:[#allocation2 + $0x50] sm:$0xff]  ;;  %v1054_v29 = vpack.c.bf16 %v2730_v23, %v2725_v21  ;;  %v2745_v30 = vld [vmem:[#allocation2 + $0x62] sm:$0xff]  ;;  %v2814_v57 = vpack.c.bf16 %v2725_v21, %v2677_v2 }
  0x23   : > { %2116 = vmatpush3.bf16.msra.mxu1 %v2420_v33  ;;  %v2741_v28 = vld [vmem:[#allocation2 + $0x52] sm:$0xff]  ;;  %v2752_v32 = vpack.c.bf16 %v2734_v25, %v2732_v24  ;;  %v2754_v33 = vld [vmem:[#allocation2 + $0x60] sm:$0xff] }
  0x24   : > { %2212 = vmatpush3.bf16.msra.mxu0 %v2421_v35  ;;  %2125 = vmatprep.subr.bf16.mxu1 %v2422_v38  ;;  %v1055_v35 = vpack.c.bf16 %v2745_v30, %v2741_v28  ;;  %v2761_v36 = vld [vmem:[#allocation2 + $0x70] sm:$0xff] }
  0x25   : > { %2221 = vmatprep.subr.bf16.mxu0 %v2423_v39  ;;  %v2763_v37 = vld [vmem:[#allocation2 + $0x72] sm:$0xff]  ;;  %v323_v41 = vpack.c.bf16 %v2761_v36, %v2754_v33 }
  0x26   : > { %2118 = vmatmul.mubr.bf16.vlgmr.msra.gmra.mrb[0].mxu1 %v2641_v40  ;;  %v2459_v2 = vld [vmem:[%s2929_s3 + $0x1d0] sm:$0xff]  }
  0x27   : > { %2126 = vmatpush3.bf16.msra.mxu1 %v2422_v38  ;;  %2214 = vmatmul.mubr.bf16.vlgmr.msra.gmra.mrb[0].mxu0 %v904_v42  ;;  %v2765_v38 = vld [vmem:[#allocation2 + $0x82] sm:$0xff] }
  0x28   : > { %2222 = vmatpush3.bf16.msra.mxu0 %v2423_v39  ;;  %2127 = vmatprep.subr.bf16.mxu1 %v2424_v43  ;;  %v2443_v39 = vld [vmem:[%s2929_s3 + $0x190] sm:$0xff]   ;;  %v595_v42 = vld [vmem:[#allocation2 + $0x2] sm:$0xff] }
  0x29   : > { %2223 = vmatprep.subr.bf16.mxu0 %v2425_v46  ;;  %2121 = vmatprep.mubr.bf16.mxu1 %v2668_v60 }
  0x2a   : > { %2217 = vmatprep.mubr.bf16.mxu0 %v905_v61  ;;  %v2824_v61 = vpack.c.bf16 %v2741_v28, %v2730_v23  ;;  %v2476_v23 = vld [vmem:[%s2929_s3 + $0x230] sm:$0xff]  }
  0x2b   : > { %2128 = vmatpush3.bf16.msra.mxu1 %v2424_v43  ;;  %v1056_v43 = vpack.c.bf16 %v2765_v38, %v2763_v37 }
  0x2c   : > { %2224 = vmatpush3.bf16.msra.mxu0 %v2425_v46  ;;  %2129 = vmatprep.subr.bf16.mxu1 %v2426_v55  ;;  %v603_v46 = vpack.c.bf16 %v2675_v1, %v595_v42  ;;  %v2831_v1 = vld [vmem:[#allocation2 + $0x80] sm:$0xff] }
  0x2d   : > { %2225 = vmatprep.subr.bf16.mxu0 %v2427_v59  ;;  %v756_v21 = vpack.c.bf16 %v2831_v1, %v2761_v36 }
  0x2e   : > { %2122 = vmatmul.mubr.bf16.gmra.mrb[4].mxu1 %v2682_v5 }
  0x2f   : > { %2130 = vmatpush3.bf16.msra.mxu1 %v2426_v55  ;;  %2218 = vmatmul.mubr.bf16.gmra.mrb[4].mxu0 %v906_v6  ;;  %v2454_v55 = vld [vmem:[%s2929_s3 + $0xc0] sm:$0xff]   ;;  %v1207_v6 = vpack.c.bf16 %v2486_v3, %v2831_v1 }
  0x30   : > { %2226 = vmatpush3.bf16.msra.mxu0 %v2427_v59  ;;  %2131 = vmatprep.subr.bf16.mxu1 %v2428_v4  ;;  %v2457_v59 = vld [vmem:[%s2929_s3 + $0x1c8] sm:$0xff]   ;;  %v2462_v3 = vld [vmem:[%s2929_s3 + $0xe0] sm:$0xff]  }
  0x31   : > { %2227 = vmatprep.subr.bf16.mxu0 %v2429_v7  ;;  %2141 = vmatprep.mubr.bf16.mxu1 %v320_v8  ;;  %v2461_v8 = vld [vmem:[%s2929_s3 + $0x1d8] sm:$0xff]  }
  0x32   : > { %2237 = vmatprep.mubr.bf16.mxu0 %v1053_v9  ;;  %v753_v9 = vpack.c.bf16 %v2718_v18, %v2672_v0  ;;  %v2464_v0 = vld [vmem:[%s2929_s3 + $0xe8] sm:$0xff]   ;;  %v755_v18 = vpack.c.bf16 %v2754_v33, %v2734_v25  ;;  %v1503_v25 = vld [vmem:[#allocation2 + $0x92] sm:$0xff] }
  0x33   : > { %2132 = vmatpush3.bf16.msra.mxu1 %v2428_v4  ;;  %v2839_v4 = vpack.c.bf16 %v2763_v37, %v2745_v30 }
  0x34   : > { %2228 = vmatpush3.bf16.msra.mxu0 %v2429_v7  ;;  %2133 = vmatprep.subr.bf16.mxu1 %v2430_v10  ;;  %v2460_v7 = vld [vmem:[%s2929_s3 + $0xd8] sm:$0xff]  }
  0x35   : > { %2229 = vmatprep.subr.bf16.mxu0 %v2431_v11 }
  0x37   : > { %2134 = vmatpush3.bf16.msra.mxu1 %v2430_v10  ;;  %v2463_v10 = vld [vmem:[%s2929_s3 + $0x1e0] sm:$0xff]  }
  0x38   : > { %2230 = vmatpush3.bf16.msra.mxu0 %v2431_v11  ;;  %2135 = vmatprep.subr.bf16.mxu1 %v2432_v12  ;;  %v2465_v11 = vld [vmem:[%s2929_s3 + $0x1e8] sm:$0xff]  }
  0x39   : > { %2231 = vmatprep.subr.bf16.mxu0 %v2433_v13 }
  0x3b   : > { %2136 = vmatpush3.bf16.msra.mxu1 %v2432_v12  ;;  %v2466_v12 = vld [vmem:[%s2929_s3 + $0xf0] sm:$0xff]  }
  0x3c   : > { %2232 = vmatpush3.bf16.msra.mxu0 %v2433_v13  ;;  %2137 = vmatprep.subr.bf16.mxu1 %v2434_v14  ;;  %v2468_v13 = vld [vmem:[%s2929_s3 + $0xf8] sm:$0xff]  }
  0x3d   : > { %2233 = vmatprep.subr.bf16.mxu0 %v2435_v15 }
  0x3f   : > { %2138 = vmatpush3.bf16.msra.mxu1 %v2434_v14  ;;  %v2469_v14 = vld [vmem:[%s2929_s3 + $0x1f8] sm:$0xff]  }
  0x40   : > { %2234 = vmatpush3.bf16.msra.mxu0 %v2435_v15  ;;  %2139 = vmatprep.subr.bf16.mxu1 %v2436_v16  ;;  %v2470_v15 = vld [vmem:[%s2929_s3 + $0x200] sm:$0xff]  }
  0x41   : > { %2235 = vmatprep.subr.bf16.mxu0 %v2437_v17 }
  0x43   : > { %2140 = vmatpush3.bf16.msra.mxu1 %v2436_v16  ;;  %v754_v16 = vpack.c.bf16 %v2732_v24, %v2720_v19  ;;  %v2472_v19 = vld [vmem:[%s2929_s3 + $0x210] sm:$0xff]   ;;  %v2477_v24 = vld [vmem:[%s2929_s3 + $0x238] sm:$0xff]  }
  0x44   : > { %2236 = vmatpush3.bf16.msra.mxu0 %v2437_v17  ;;  %2149 = vmatprep.subr.bf16.mxu1 %v2438_v20  ;;  %v2471_v17 = vld [vmem:[%s2929_s3 + $0x208] sm:$0xff]  }
  0x45   : > { %2245 = vmatprep.subr.bf16.mxu0 %v2439_v22 }
  0x46   : > { %2142 = vmatmul.mubr.bf16.vlgmr.msra.gmra.mrb[0].mxu1 %v321_v26 }
  0x47   : > { %2150 = vmatpush3.bf16.msra.mxu1 %v2438_v20  ;;  %2238 = vmatmul.mubr.bf16.vlgmr.msra.gmra.mrb[0].mxu0 %v1054_v29  ;;  %v1353_v20 = vld [vmem:[#allocation2 + $0x91] sm:$0xff] }
  0x48   : > { %2246 = vmatpush3.bf16.msra.mxu0 %v2439_v22  ;;  %2151 = vmatprep.subr.bf16.mxu1 %v2440_v27  ;;  %v1357_v22 = vpack.c.bf16 %v1353_v20, %v2670_v63  ;;  %v2475_v63 = vld [vmem:[%s2929_s3 + $0x228] sm:$0xff]  }
  0x49   : > { %2247 = vmatprep.subr.bf16.mxu0 %v2441_v31  ;;  %2145 = vmatprep.mubr.bf16.mxu1 %v2752_v32 }
  0x4a   : > { %2241 = vmatprep.mubr.bf16.mxu0 %v1055_v35 }
  0x4b   : > { %2152 = vmatpush3.bf16.msra.mxu1 %v2440_v27 }
  0x4c   : > { %2248 = vmatpush3.bf16.msra.mxu0 %v2441_v31  ;;  %2153 = vmatprep.subr.bf16.mxu1 %v2442_v34 }
  0x4d   : > { %2249 = vmatprep.subr.bf16.mxu0 %v2443_v39 }
  0x4e   : > { %2146 = vmatmul.mubr.bf16.gmra.mrb[4].mxu1 %v323_v41 }
  0x4f   : > { %2154 = vmatpush3.bf16.msra.mxu1 %v2442_v34  ;;  %2242 = vmatmul.mubr.bf16.gmra.mrb[4].mxu0 %v1056_v43 }
  0x50   : > { %2250 = vmatpush3.bf16.msra.mxu0 %v2443_v39  ;;  %2155 = vmatprep.subr.bf16.mxu1 %v2444_v44 }
  0x51   : > { %2251 = vmatprep.subr.bf16.mxu0 %v2445_v45  ;;  %2165 = vmatprep.mubr.bf16.mxu1 %v603_v46 }
  0x52   : > { %2261 = vmatprep.mubr.bf16.mxu0 %v321_v26  ;;  %v1507_v26 = vpack.c.bf16 %v1503_v25, %v2765_v38 }
  0x53   : > { %2156 = vmatpush3.bf16.msra.mxu1 %v2444_v44 }
  0x54   : > { %2252 = vmatpush3.bf16.msra.mxu0 %v2445_v45  ;;  %2157 = vmatprep.subr.bf16.mxu1 %v2446_v47 }
  0x55   : > { %2253 = vmatprep.subr.bf16.mxu0 %v2447_v48 }
  0x57   : > { %2158 = vmatpush3.bf16.msra.mxu1 %v2446_v47 }
  0x58   : > { %2254 = vmatpush3.bf16.msra.mxu0 %v2447_v48  ;;  %2159 = vmatprep.subr.bf16.mxu1 %v2448_v49 }
  0x59   : > { %2255 = vmatprep.subr.bf16.mxu0 %v2449_v50 }
  0x5b   : > { %2160 = vmatpush3.bf16.msra.mxu1 %v2448_v49 }
  0x5c   : > { %2256 = vmatpush3.bf16.msra.mxu0 %v2449_v50  ;;  %2161 = vmatprep.subr.bf16.mxu1 %v2450_v51 }
  0x5d   : > { %2257 = vmatprep.subr.bf16.mxu0 %v2451_v52 }
  0x5f   : > { %2162 = vmatpush3.bf16.msra.mxu1 %v2450_v51 }
  0x60   : > { %2258 = vmatpush3.bf16.msra.mxu0 %v2451_v52  ;;  %2163 = vmatprep.subr.bf16.mxu1 %v2452_v53 }
  0x61   : > { %2259 = vmatprep.subr.bf16.mxu0 %v2453_v54 }
  0x63   : > { %2164 = vmatpush3.bf16.msra.mxu1 %v2452_v53 }
  0x64   : > { %2260 = vmatpush3.bf16.msra.mxu0 %v2453_v54  ;;  %2173 = vmatprep.subr.bf16.mxu1 %v2454_v55 }
  0x65   : > { %2269 = vmatprep.subr.bf16.mxu0 %v2455_v56 }
  0x66   : > { %2166 = vmatmul.mubr.bf16.vlgmr.msra.gmra.mrb[0].mxu1 %v2814_v57 }
  0x67   : > { %2174 = vmatpush3.bf16.msra.mxu1 %v2454_v55  ;;  %2262 = vmatmul.mubr.bf16.vlgmr.msra.gmra.mrb[0].mxu0 %v2752_v32 }
  0x68   : > { %2270 = vmatpush3.bf16.msra.mxu0 %v2455_v56  ;;  %2175 = vmatprep.subr.bf16.mxu1 %v2456_v58 }
  0x69   : > { %2271 = vmatprep.subr.bf16.mxu0 %v2457_v59  ;;  %2169 = vmatprep.mubr.bf16.mxu1 %v2824_v61 }
  0x6a   : > { %2265 = vmatprep.mubr.bf16.mxu0 %v323_v41 }
  0x6b   : > { %2176 = vmatpush3.bf16.msra.mxu1 %v2456_v58 }
  0x6c   : > { %2272 = vmatpush3.bf16.msra.mxu0 %v2457_v59  ;;  %2177 = vmatprep.subr.bf16.mxu1 %v2458_v62 }
  0x6d   : > { %2273 = vmatprep.subr.bf16.mxu0 %v2459_v2 }
  0x6e   : > { %2170 = vmatmul.mubr.bf16.gmra.mrb[4].mxu1 %v2839_v4 }
  0x6f   : > { %2178 = vmatpush3.bf16.msra.mxu1 %v2458_v62  ;;  %2266 = vmatmul.mubr.bf16.gmra.mrb[4].mxu0 %v1207_v6 }
  0x70   : > { %2274 = vmatpush3.bf16.msra.mxu0 %v2459_v2  ;;  %2179 = vmatprep.subr.bf16.mxu1 %v2460_v7 }
  0x71   : > { %2275 = vmatprep.subr.bf16.mxu0 %v2461_v8  ;;  %2189 = vmatprep.mubr.bf16.mxu1 %v753_v9 }
  0x72   : > { %2285 = vmatprep.mubr.bf16.mxu0 %v2641_v40  ;;  %v2467_v40 = vld [vmem:[%s2929_s3 + $0x1f0] sm:$0xff]  }
  0x73   : > { %2180 = vmatpush3.bf16.msra.mxu1 %v2460_v7 }
  0x74   : > { %2276 = vmatpush3.bf16.msra.mxu0 %v2461_v8  ;;  %2181 = vmatprep.subr.bf16.mxu1 %v2462_v3 }
  0x75   : > { %2277 = vmatprep.subr.bf16.mxu0 %v2463_v10 }
  0x77   : > { %2182 = vmatpush3.bf16.msra.mxu1 %v2462_v3 }
  0x78   : > { %2278 = vmatpush3.bf16.msra.mxu0 %v2463_v10  ;;  %2183 = vmatprep.subr.bf16.mxu1 %v2464_v0 }
  0x79   : > { %2279 = vmatprep.subr.bf16.mxu0 %v2465_v11 }
  0x7b   : > { %2184 = vmatpush3.bf16.msra.mxu1 %v2464_v0 }
  0x7c   : > { %2280 = vmatpush3.bf16.msra.mxu0 %v2465_v11  ;;  %2185 = vmatprep.subr.bf16.mxu1 %v2466_v12 }
  0x7d   : > { %2281 = vmatprep.subr.bf16.mxu0 %v2467_v40 }
  0x7f   : > { %2186 = vmatpush3.bf16.msra.mxu1 %v2466_v12 }
  0x80   : > { %2282 = vmatpush3.bf16.msra.mxu0 %v2467_v40  ;;  %2187 = vmatprep.subr.bf16.mxu1 %v2468_v13 }
  0x81   : > { %2283 = vmatprep.subr.bf16.mxu0 %v2469_v14 }
  0x83   : > { %2188 = vmatpush3.bf16.msra.mxu1 %v2468_v13 }
  0x84   : > { %2284 = vmatpush3.bf16.msra.mxu0 %v2469_v14  ;;  %2317 = vmatprep.subr.bf16.mxu1 %v2470_v15 }
  0x85   : > { %2293 = vmatprep.subr.bf16.mxu0 %v2470_v15 }
  0x86   : > { %2190 = vmatmul.mubr.bf16.vlgmr.msra.gmra.mrb[0].mxu1 %v754_v16 }
  0x87   : > { %2286 = vmatmul.mubr.bf16.vlgmr.msra.gmra.mrb[0].mxu0 %v2668_v60  ;;  %2325 = vmatpush3.bf16.msra.mxu1 %v2470_v15  ;;  %v2473_v60 = vld [vmem:[%s2929_s3 + $0x218] sm:$0xff]  }
  0x88   : > { %2294 = vmatpush3.bf16.msra.mxu0 %v2470_v15  ;;  %2318 = vmatprep.subr.bf16.mxu1 %v2471_v17 }
  0x89   : > { %2295 = vmatprep.subr.bf16.mxu0 %v2471_v17  ;;  %2193 = vmatprep.mubr.bf16.mxu1 %v755_v18 }
  0x8a   : > { %2289 = vmatprep.mubr.bf16.mxu0 %v2682_v5  ;;  %v2474_v5 = vld [vmem:[%s2929_s3 + $0x220] sm:$0xff]  }
  0x8b   : > { %2326 = vmatpush3.bf16.msra.mxu1 %v2471_v17 }
  0x8c   : > { %2296 = vmatpush3.bf16.msra.mxu0 %v2471_v17  ;;  %2319 = vmatprep.subr.bf16.mxu1 %v2472_v19 }
  0x8d   : > { %2297 = vmatprep.subr.bf16.mxu0 %v2472_v19 }
  0x8e   : > { %2194 = vmatmul.mubr.bf16.gmra.mrb[4].mxu1 %v756_v21 }
  0x8f   : > { %2290 = vmatmul.mubr.bf16.gmra.mrb[4].mxu0 %v1357_v22  ;;  %2327 = vmatpush3.bf16.msra.mxu1 %v2472_v19 }
  0x90   : > { %2298 = vmatpush3.bf16.msra.mxu0 %v2472_v19  ;;  %2320 = vmatprep.subr.bf16.mxu1 %v2473_v60 }
  0x91   : > { %2299 = vmatprep.subr.bf16.mxu0 %v2473_v60  ;;  %2309 = vmatprep.mubr.bf16.mxu0 %v2814_v57 }
  0x92   : > { %2313 = vmatprep.mubr.bf16.mxu1 %v2839_v4 }
  0x93   : > { %2328 = vmatpush3.bf16.msra.mxu1 %v2473_v60 }
  0x94   : > { %2300 = vmatpush3.bf16.msra.mxu0 %v2473_v60  ;;  %2321 = vmatprep.subr.bf16.mxu1 %v2474_v5 }
  0x95   : > { %2301 = vmatprep.subr.bf16.mxu0 %v2474_v5 }
  0x97   : > { %2329 = vmatpush3.bf16.msra.mxu1 %v2474_v5 }
  0x98   : > { %2302 = vmatpush3.bf16.msra.mxu0 %v2474_v5  ;;  %2322 = vmatprep.subr.bf16.mxu1 %v2475_v63 }
  0x99   : > { %2303 = vmatprep.subr.bf16.mxu0 %v2475_v63 }
  0x9b   : > { %2330 = vmatpush3.bf16.msra.mxu1 %v2475_v63 }
  0x9c   : > { %2304 = vmatpush3.bf16.msra.mxu0 %v2475_v63  ;;  %2323 = vmatprep.subr.bf16.mxu1 %v2476_v23 }
  0x9d   : > { %2305 = vmatprep.subr.bf16.mxu0 %v2476_v23 }
  0x9f   : > { %2331 = vmatpush3.bf16.msra.mxu1 %v2476_v23 }
  0xa0   : > { %2306 = vmatpush3.bf16.msra.mxu0 %v2476_v23  ;;  %2324 = vmatprep.subr.bf16.mxu1 %v2477_v24 }
  0xa1   : > { %2307 = vmatprep.subr.bf16.mxu0 %v2477_v24 }
  0xa3   : > { %2332 = vmatpush3.bf16.msra.mxu1 %v2477_v24 }
  0xa4   : > { %2308 = vmatpush3.bf16.msra.mxu0 %v2477_v24 }
  0xa6   : > { %2314 = vmatmul.mubr.bf16.vlgmr.msra.gmra.mrb[8].mxu1 %v1507_v26 }
  0xa7   : > { %2310 = vmatmul.mubr.bf16.vlgmr.msra.gmra.mrb[0].mxu0 %v2824_v61 }
 0x159   : > { %v2191_v27 = vpop.f32.mrb[0].mxu1 }
 0x15a   : > { %v856_v28 = vpop.f32.mrb[1].mxu1 }
 0x15b   : > { %v2192_v29 = vpop.f32.mrb[2].mxu1 }
 0x15c   : > { %v859_v30 = vpop.f32.mrb[3].mxu1 }
 0x161   : > { %v2195_v31 = vpop.f32.mrb[4].mxu1 }
 0x162   : > { %v2291_v32 = vpop.f32.mrb[4].mxu0  ;;  %v872_v33 = vpop.f32.mrb[5].mxu1 }
 0x163   : > { %v2337_v34 = vadd.f32 %v2291_v32, %v2195_v31  ;;  %v1473_v35 = vpop.f32.mrb[5].mxu0  ;;  %v2196_v36 = vpop.f32.mrb[6].mxu1 }
 0x164   : > { %v2339_v37 = vadd.f32 %v1473_v35, %v872_v33  ;;  %v2292_v39 = vpop.f32.mrb[6].mxu0  ;;  %v875_v41 = vpop.f32.mrb[7].mxu1 }
 0x165   : > { %v2341_v38 = vadd.f32 %v2292_v39, %v2196_v36  ;;  %v1476_v42 = vpop.f32.mrb[7].mxu0 }
 0x166   : > { %v2343_v43 = vadd.f32 %v1476_v42, %v875_v41 }
 0x179   : > { %v2315_v44 = vpop.f32.mrb[8].mxu1 }
 0x17a   : > { %v2311_v45 = vpop.f32.mrb[0].mxu0  ;;  %v2338_v46 = vadd.f32 %v2337_v34, %v2315_v44  ;;  %v1623_v47 = vpop.f32.mrb[9].mxu1 }
 0x17b   : > { %v2333_v48 = vadd.f32 %v2311_v45, %v2191_v27  ;;  %v1607_v49 = vpop.f32.mrb[1].mxu0  ;;  %v2340_v50 = vadd.f32 %v2339_v37, %v1623_v47  ;;  %v2316_v51 = vpop.f32.mrb[10].mxu1 }
 0x17c   : > { %1652 = vst [vmem:[%s231_s20 + $0x30] sm:$0xff] %v2338_v46  ;;  %v2334_v52 = vadd.f32 %v1607_v49, %v856_v28  ;;  %v2312_v53 = vpop.f32.mrb[2].mxu0  ;;  %v2342_v54 = vadd.f32 %v2341_v38, %v2316_v51  ;;  %v1626_v55 = vpop.f32.mrb[11].mxu1  ;;  %v1673_v13 = vmul.f32 %v2338_v46, %v2338_v46 }
 0x17d   : > { %1648 = vst [vmem:[%s231_s20 + $0x10] sm:$0xff] %v2333_v48  ;;  %1650 = vst [vmem:[%s231_s20 + $0x20] sm:$0xff] %v2340_v50  ;;  %v2335_v56 = vadd.f32 %v2312_v53, %v2192_v29  ;;  %v1610_v57 = vpop.f32.mrb[3].mxu0  ;;  %v2344_v58 = vadd.f32 %v2343_v43, %v1626_v55  ;;  %v1669_v2 = vmul.f32 %v2333_v48, %v2333_v48 }
 0x17e   : > { %1646 = vst [vmem:[%s231_s20] sm:$0xff] %v2334_v52  ;;  %1653 = vst [vmem:[%s231_s20 + $0x38] sm:$0xff] %v2342_v54  ;;  %v2336_v59 = vadd.f32 %v1610_v57, %v859_v30  ;;  %v1667_v61 = vmul.f32 %v2334_v52, %v2334_v52  ;;  %v1671_v3 = vmul.f32 %v2340_v50, %v2340_v50 }
 0x17f   : > { %1649 = vst [vmem:[%s231_s20 + $0x18] sm:$0xff] %v2335_v56  ;;  %1651 = vst [vmem:[%s231_s20 + $0x28] sm:$0xff] %v2344_v58  ;;  %v1670_v7 = vmul.f32 %v2335_v56, %v2335_v56  ;;  %v1672_v12 = vmul.f32 %v2344_v58, %v2344_v58  ;;  %v1674_v16 = vmul.f32 %v2342_v54, %v2342_v54 }
 0x180   : > { %1647 = vst [vmem:[%s231_s20 + $0x8] sm:$0xff] %v2336_v59  ;;  %v1654_v62 = vadd.f32 %v2336_v59, %v2334_v52  ;;  %v1668_v1 = vmul.f32 %v2336_v59, %v2336_v59 }
 0x182   : > { %v1655_v4 = vadd.f32 %v2333_v48, %v1654_v62  ;;  %v1675_v6 = vadd.f32 %v1668_v1, %v1667_v61 }
 0x184   : > { %v1676_v8 = vadd.f32 %v1675_v6, %v1669_v2  ;;  %v1656_v9 = vadd.f32 %v2335_v56, %v1655_v4 }
 0x186   : > { %v1657_v10 = vadd.f32 %v2340_v50, %v1656_v9  ;;  %v1677_v0 = vadd.f32 %v1676_v8, %v1670_v7 }
 0x188   : > { %v1658_v11 = vadd.f32 %v2344_v58, %v1657_v10  ;;  %v1678_v40 = vadd.f32 %v1677_v0, %v1671_v3 }
 0x18a   : > { %v1659_v14 = vadd.f32 %v2338_v46, %v1658_v11  ;;  %v1679_v15 = vadd.f32 %v1678_v40, %v1672_v12 }
 0x18c   : > { %v1660_v17 = vadd.f32 %v2342_v54, %v1659_v14  ;;  %v1680_v18 = vadd.f32 %v1679_v15, %v1673_v13 }
 0x18e   : > { %v1661_v20 = vrot.slane %v1660_v17, 4  ;;  %v1681_v19 = vadd.f32 %v1680_v18, %v1674_v16 }
 0x190   : > { %v1662_v21 = vadd.f32 %v1661_v20, %v1660_v17  ;;  %v1682_v22 = vrot.slane %v1681_v19, 4 }
 0x192   : > { %v1663_v60 = vrot.slane %v1662_v21, 2  ;;  %v1683_v5 = vadd.f32 %v1682_v22, %v1681_v19 }
 0x194   : > { %v1664_v63 = vadd.f32 %v1663_v60, %v1662_v21  ;;  %v1684_v23 = vrot.slane %v1683_v5, 2 }
 0x196   : > { %v1665_v24 = vrot.slane %v1664_v63, 1  ;;  %v1685_v25 = vadd.f32 %v1684_v23, %v1683_v5 }
 0x198   : > { %v1686_v26 = vrot.slane %v1685_v25, 1  ;;  %v1666_v27 = vadd.f32 %v1665_v24, %v1664_v63 }
 0x19a   : > { %v1687_v28 = vadd.f32 %v1686_v26, %v1685_v25 }
 0x19c   : > { %v1689_v29 = vsel %vm1688_vm0, %v1666_v27, %v1687_v28 }
 0x19d   : > { %1690 = vst [vmem:[%s235_s24] sm:$0x3] %v1689_v29 }
 0x19e PF: > { %s16_s18 = sadd.s32 1, %s2484_s18  }
 0x19f   : > { %p13_p4 = scmp.ge.s32.totalorder %s16_s18, 4  }
 0x1a1   :  { %15 = sbr.rel (!%p13_p4) target bundleno = 1 (0x1), region = 88 }

</bundles_post_ra>
